<compile_context>
chip_gen: v7x
topology: tpu7x:2x2x1
jax: 0.10.0
libtpu: 0.0.40
codegen_flags: <defaults>
</compile_context>

<pallas_src>
import functools

import jax
import jax.numpy as jnp
from jax.experimental import pallas as pl
from jax.experimental.pallas import tpu as pltpu


# -----------------------------------------------------------------------------
# Weight packing: fold the 3 kw taps (and the left/right SAME zero padding)
# of a 3x3 conv into per-kh block-Toeplitz matrices, done once per layer in
# the wrapper.  Row layout of activations is (H rows, W*Cin lanes).
# -----------------------------------------------------------------------------
def _block_toeplitz_weights(w, width):
    """w: (3, 3, Cin, Cout) HWIO conv weights -> (3, width*Cin, width*Cout)."""
    _, _, cin, cout = w.shape
    taps = []
    for kh in range(3):
        t = jnp.zeros((width * cin, width * cout), w.dtype)
        for kw in range(3):
            for wo in range(width):
                wi = wo + kw - 1          # SAME padding: out col wo reads in col wi
                if 0 <= wi < width:
                    t = t.at[wi * cin:(wi + 1) * cin,
                             wo * cout:(wo + 1) * cout].set(w[kh, kw])
        taps.append(t)
    return jnp.stack(taps, axis=0)


# -----------------------------------------------------------------------------
# Fused backbone kernel: one batch element per grid step.  Activations live in
# a row-padded VMEM scratch (rows 0 and H+1 are the zero halo); each layer is
# 3 big matmuls + bias + ReLU; extracted layers are stored lane-dense.
# -----------------------------------------------------------------------------
def _fused_backbone_kernel(*refs, H, W, chans, extract_idx):
    n_layers = len(chans) - 1
    n_out = len(extract_idx)
    x_ref = refs[0]
    layer_refs = refs[1:1 + 2 * n_layers]                  # (T, bias) per layer
    out_refs = refs[1 + 2 * n_layers:1 + 2 * n_layers + n_out]
    scr = refs[-1]                                         # (H+2, W*Cmax) f32

    # Zero the scratch once: rows 0 and H+1 stay zero for the whole kernel
    # (this replaces the wrapper-side jnp.pad halo).
    scr[...] = jnp.zeros_like(scr)
    cin = chans[0]
    scr[1:H + 1, 0:W * cin] = x_ref[0]

    out_i = 0
    c_prev = cin
    for li in range(n_layers):
        t_ref = layer_refs[2 * li]        # (3, W*c_prev, W*cout)
        b_ref = layer_refs[2 * li + 1]    # (1, W*cout), bias pre-tiled over W
        cout = chans[li + 1]

        acc = jnp.zeros((H, W * cout), jnp.float32)
        for kh in range(3):
            acc = acc + jnp.dot(
                scr[kh:kh + H, 0:W * c_prev], t_ref[kh],
                preferred_element_type=jnp.float32)
        act = jnp.maximum(acc + b_ref[...], 0.0)

        if li in extract_idx:
            out_refs[out_i][0] = act.astype(out_refs[out_i].dtype)
            out_i += 1
        if li + 1 < n_layers:
            scr[1:H + 1, 0:W * cout] = act
        c_prev = cout


def fused_backbone(x_nhwc, layer_params, extract_idx):
    """Run the fused backbone.

    x_nhwc:       (B, H, W, Cin) float32
    layer_params: list of (T(3, W*ci, W*co), bias(1, W*co), cout) per layer
    extract_idx:  tuple of layer indices whose activations are returned
    Returns a list of lane-dense slabs (B, H, W*cout), one per extracted layer.
    """
    B, H, W, Cin = x_nhwc.shape
    chans = [Cin] + [p[2] for p in layer_params]
    cmax = max(chans)
    x2d = x_nhwc.reshape(B, H, W * Cin)      # free row-major reshape, lane-dense

    in_specs = [pl.BlockSpec((1, H, W * Cin), lambda b: (b, 0, 0))]
    operands = [x2d]
    for (t, bias, _cout) in layer_params:
        in_specs.append(pl.BlockSpec(t.shape, lambda b: (0, 0, 0)))
        in_specs.append(pl.BlockSpec(bias.shape, lambda b: (0, 0)))
        operands.extend([t, bias])

    out_shapes = []
    out_specs = []
    for li in extract_idx:
        cout = chans[li + 1]
        out_shapes.append(jax.ShapeDtypeStruct((B, H, W * cout), jnp.float32))
        out_specs.append(pl.BlockSpec((1, H, W * cout), lambda b: (b, 0, 0)))

    flops = 2 * B * H * W * 9 * sum(
        chans[i] * chans[i + 1] for i in range(len(chans) - 1))
    bytes_accessed = (
        x2d.size * 4
        + sum(t.size * 4 + bias.size * 4 for t, bias, _ in layer_params)
        + sum(B * H * W * chans[li + 1] * 4 for li in extract_idx))

    kernel = functools.partial(
        _fused_backbone_kernel, H=H, W=W, chans=tuple(chans),
        extract_idx=tuple(extract_idx))

    outs = pl.pallas_call(
        kernel,
        out_shape=tuple(out_shapes),
        grid_spec=pltpu.PrefetchScalarGridSpec(
            num_scalar_prefetch=0,
            grid=(B,),
            in_specs=in_specs,
            out_specs=tuple(out_specs),
            scratch_shapes=[pltpu.VMEM((H + 2, W * cmax), jnp.float32)],
        ),
        compiler_params=pltpu.CompilerParams(
            dimension_semantics=("parallel",)),
        cost_estimate=pl.CostEstimate(
            flops=flops, transcendentals=0, bytes_accessed=bytes_accessed),
    )(*operands)
    if not isinstance(outs, (tuple, list)):
        outs = (outs,)
    return list(outs)


# -----------------------------------------------------------------------------
# NetworkFeatureAggregator: mirrors the PyTorch hook semantics (run only up to
# the last layer in layers_to_extract_from, collect named feature maps).
# -----------------------------------------------------------------------------
class NetworkFeatureAggregator:
    def __init__(self, backbone_params, layer_order, layers_to_extract_from):
        self.backbone_params = backbone_params          # {name: (w, b)}
        self.layer_order = list(layer_order)            # forward order
        self.layers_to_extract_from = list(layers_to_extract_from)
        self.outputs = {}
        # Statically truncate at the last layer to extract (emulates the
        # forward-hook LastLayerToExtractReachedException break).
        last = self.layers_to_extract_from[-1]
        self._run_layers = self.layer_order[:self.layer_order.index(last) + 1]
        self._extract_idx = tuple(
            i for i, n in enumerate(self._run_layers)
            if n in self.layers_to_extract_from)
        self._packed_cache = {}   # spatial width -> packed (T, bias, cout) list

    def _packed_params(self, width):
        if width not in self._packed_cache:
            packed = []
            for name in self._run_layers:
                w, b = self.backbone_params[name]
                cout = w.shape[-1]
                t = _block_toeplitz_weights(w, width)
                bias = jnp.tile(b, width).reshape(1, width * cout)
                packed.append((t, bias, cout))
            self._packed_cache[width] = packed
        return self._packed_cache[width]

    def forward(self, images_nchw):
        self.outputs.clear()
        B, _, H, W = images_nchw.shape
        x = jnp.transpose(images_nchw, (0, 2, 3, 1))        # NCHW -> NHWC
        packed = self._packed_params(W)
        slabs = fused_backbone(x, packed, self._extract_idx)
        # TODO(synk): emit NCHW directly from the kernel (in-kernel XLU
        # transpose) to drop this small per-extract transpose pass.
        for slab, li in zip(slabs, self._extract_idx):
            name = self._run_layers[li]
            cout = packed[li][2]
            fmap = slab.reshape(B, H, W, cout)               # free reshape
            self.outputs[name] = jnp.transpose(fmap, (0, 3, 1, 2))
        return dict(self.outputs)

    __call__ = forward

    def feature_dimensions(self, input_shape):
        _input = jnp.ones([1] + list(input_shape), dtype=jnp.float32)
        _output = self(_input)
        return [_output[layer].shape[1] for layer in self.layers_to_extract_from]


# -----------------------------------------------------------------------------
# Synthetic backbone + correctness check.
# -----------------------------------------------------------------------------
def _init_backbone(key):
    """Deterministic synthetic backbone params: 4 -> 8 -> 16 -> 32 channels."""
    dims = [("layer1", 4, 8), ("layer2", 8, 16), ("layer3", 16, 32)]
    params = {}
    for i, (name, cin, cout) in enumerate(dims):
        kw_key, kb_key = jax.random.split(jax.random.fold_in(key, i))
        w = jax.random.normal(kw_key, (3, 3, cin, cout), jnp.float32) * (
            1.0 / jnp.sqrt(9.0 * cin))
        b = 0.01 * jax.random.normal(kb_key, (cout,), jnp.float32)
        params[name] = (w, b)
    return params, [d[0] for d in dims]


def _reference_conv3x3_relu(x_nhwc, w, b):
    """Plain-XLA reference for correctness checking."""
    y = jax.lax.conv_general_dilated(
        x_nhwc, w, window_strides=(1, 1), padding="SAME",
        dimension_numbers=("NHWC", "HWIO", "NHWC"))
    return jnp.maximum(y + b[None, None, None, :], 0.0)


if __name__ == "__main__":
    key = jax.random.PRNGKey(0)
    params, layer_order = _init_backbone(key)

    aggregator = NetworkFeatureAggregator(
        backbone_params=params,
        layer_order=layer_order,
        layers_to_extract_from=["layer2", "layer3"],
    )

    # Small deterministic NCHW input, matching the PyTorch convention.
    images = jax.random.normal(jax.random.PRNGKey(1), (2, 4, 16, 16), jnp.float32)

    outputs = aggregator(images)
    outputs = {k: jax.block_until_ready(v) for k, v in outputs.items()}

    # Sanity check against a plain-XLA reference of the same backbone.
    x_ref = jnp.transpose(images, (0, 2, 3, 1))
    ref = {}
    for name in layer_order:
        w, b = params[name]
        x_ref = _reference_conv3x3_relu(x_ref, w, b)
        if name in aggregator.layers_to_extract_from:
            ref[name] = jnp.transpose(x_ref, (0, 3, 1, 2))
    for name in aggregator.layers_to_extract_from:
        assert outputs[name].shape == ref[name].shape, (name, outputs[name].shape)
        err = float(jnp.max(jnp.abs(outputs[name] - ref[name])))
        assert err < 1e-3, f"{name}: max abs err {err}"

    # feature_dimensions mirrors the PyTorch helper (channel dims of extracts).
    dims = aggregator.feature_dimensions([4, 16, 16])
    assert dims == [16, 32], dims

    print("KERNEL_OK")
</pallas_src>

<mosaic_0001>
module attributes {stable_mosaic.version = 11 : i64} {
  func.func @_fused_backbone_kernel(%arg0: i32, %arg1: memref<1x16x64xf32, #tpu.memory_space<vmem>>, %arg2: memref<3x64x128xf32, #tpu.memory_space<vmem>>, %arg3: memref<1x128xf32, #tpu.memory_space<vmem>>, %arg4: memref<3x128x256xf32, #tpu.memory_space<vmem>>, %arg5: memref<1x256xf32, #tpu.memory_space<vmem>>, %arg6: memref<3x256x512xf32, #tpu.memory_space<vmem>>, %arg7: memref<1x512xf32, #tpu.memory_space<vmem>>, %arg8: memref<1x16x256xf32, #tpu.memory_space<vmem>>, %arg9: memref<1x16x512xf32, #tpu.memory_space<vmem>>, %arg10: memref<18x512xf32, #tpu.memory_space<vmem>>) attributes {dimension_semantics = [#tpu.dimension_semantics<parallel>], iteration_bounds = array<i64: 2>, scalar_prefetch = 0 : i64, scratch_operands = 1 : i64, tpu.core_type = #tpu.core_type<tc>, window_params = [{transform_indices = @transform_0, window_bounds = array<i64: 1, 16, 64>}, {pipeline_mode = #tpu.pipeline_mode<synchronous>, transform_indices = @transform_1, window_bounds = array<i64: 3, 64, 128>}, {pipeline_mode = #tpu.pipeline_mode<synchronous>, transform_indices = @transform_2, window_bounds = array<i64: 1, 128>}, {pipeline_mode = #tpu.pipeline_mode<synchronous>, transform_indices = @transform_3, window_bounds = array<i64: 3, 128, 256>}, {pipeline_mode = #tpu.pipeline_mode<synchronous>, transform_indices = @transform_4, window_bounds = array<i64: 1, 256>}, {pipeline_mode = #tpu.pipeline_mode<synchronous>, transform_indices = @transform_5, window_bounds = array<i64: 3, 256, 512>}, {pipeline_mode = #tpu.pipeline_mode<synchronous>, transform_indices = @transform_6, window_bounds = array<i64: 1, 512>}, {transform_indices = @transform_7, window_bounds = array<i64: 1, 16, 256>}, {transform_indices = @transform_8, window_bounds = array<i64: 1, 16, 512>}]} {
    %cst = arith.constant 0.000000e+00 : f32
    %0 = vector.broadcast %cst : f32 to vector<18x512xf32>
    %c0 = arith.constant 0 : index
    %c0_0 = arith.constant 0 : index
    %1 = vector.load %arg10[%c0, %c0_0] : memref<18x512xf32, #tpu.memory_space<vmem>>, vector<18x512xf32>
    tpu.vector_store %arg10[%c0, %c0_0], %0 {strides = array<i32>} : memref<18x512xf32, #tpu.memory_space<vmem>>, vector<18x512xf32>,
    %c0_1 = arith.constant 0 : index
    %c0_2 = arith.constant 0 : index
    %c0_3 = arith.constant 0 : index
    %2 = vector.load %arg1[%c0_1, %c0_2, %c0_3] : memref<1x16x64xf32, #tpu.memory_space<vmem>>, vector<1x16x64xf32>
    %3 = vector.shape_cast %2 : vector<1x16x64xf32> to vector<16x64xf32>
    %c1 = arith.constant 1 : index
    %c0_4 = arith.constant 0 : index
    %4 = vector.load %arg10[%c1, %c0_4] : memref<18x512xf32, #tpu.memory_space<vmem>>, vector<16x64xf32>
    tpu.vector_store %arg10[%c1, %c0_4], %3 {strides = array<i32>} : memref<18x512xf32, #tpu.memory_space<vmem>>, vector<16x64xf32>,
    %cst_5 = arith.constant 0.000000e+00 : f32
    %5 = vector.broadcast %cst_5 : f32 to vector<16x128xf32>
    %c0_6 = arith.constant 0 : index
    %c0_7 = arith.constant 0 : index
    %6 = vector.load %arg10[%c0_6, %c0_7] : memref<18x512xf32, #tpu.memory_space<vmem>>, vector<16x64xf32>
    %c0_8 = arith.constant 0 : index
    %c0_9 = arith.constant 0 : index
    %c0_10 = arith.constant 0 : index
    %7 = vector.load %arg2[%c0_8, %c0_9, %c0_10] : memref<3x64x128xf32, #tpu.memory_space<vmem>>, vector<1x64x128xf32>
    %8 = vector.shape_cast %7 : vector<1x64x128xf32> to vector<64x128xf32>
    %cst_11 = arith.constant dense<0.000000e+00> : vector<16x128xf32>
    %9 = tpu.matmul %6, %8, %cst_11 {dimension_numbers = #tpu.dot_dimension_numbers<[1], [0], [0], [1], [0, 0, 1, 1], [], []>} : vector<16x64xf32>, vector<64x128xf32>, vector<16x128xf32> -> vector<16x128xf32>
    %10 = arith.addf %5, %9 : vector<16x128xf32>
    %c1_12 = arith.constant 1 : index
    %c0_13 = arith.constant 0 : index
    %11 = vector.load %arg10[%c1_12, %c0_13] : memref<18x512xf32, #tpu.memory_space<vmem>>, vector<16x64xf32>
    %c1_14 = arith.constant 1 : index
    %c0_15 = arith.constant 0 : index
    %c0_16 = arith.constant 0 : index
    %12 = vector.load %arg2[%c1_14, %c0_15, %c0_16] : memref<3x64x128xf32, #tpu.memory_space<vmem>>, vector<1x64x128xf32>
    %13 = vector.shape_cast %12 : vector<1x64x128xf32> to vector<64x128xf32>
    %cst_17 = arith.constant dense<0.000000e+00> : vector<16x128xf32>
    %14 = tpu.matmul %11, %13, %cst_17 {dimension_numbers = #tpu.dot_dimension_numbers<[1], [0], [0], [1], [0, 0, 1, 1], [], []>} : vector<16x64xf32>, vector<64x128xf32>, vector<16x128xf32> -> vector<16x128xf32>
    %15 = arith.addf %10, %14 : vector<16x128xf32>
    %c2 = arith.constant 2 : index
    %c0_18 = arith.constant 0 : index
    %16 = vector.load %arg10[%c2, %c0_18] : memref<18x512xf32, #tpu.memory_space<vmem>>, vector<16x64xf32>
    %c2_19 = arith.constant 2 : index
    %c0_20 = arith.constant 0 : index
    %c0_21 = arith.constant 0 : index
    %17 = vector.load %arg2[%c2_19, %c0_20, %c0_21] : memref<3x64x128xf32, #tpu.memory_space<vmem>>, vector<1x64x128xf32>
    %18 = vector.shape_cast %17 : vector<1x64x128xf32> to vector<64x128xf32>
    %cst_22 = arith.constant dense<0.000000e+00> : vector<16x128xf32>
    %19 = tpu.matmul %16, %18, %cst_22 {dimension_numbers = #tpu.dot_dimension_numbers<[1], [0], [0], [1], [0, 0, 1, 1], [], []>} : vector<16x64xf32>, vector<64x128xf32>, vector<16x128xf32> -> vector<16x128xf32>
    %20 = arith.addf %15, %19 : vector<16x128xf32>
    %c0_23 = arith.constant 0 : index
    %c0_24 = arith.constant 0 : index
    %21 = vector.load %arg3[%c0_23, %c0_24] : memref<1x128xf32, #tpu.memory_space<vmem>>, vector<1x128xf32>
    %22 = vector.broadcast %21 : vector<1x128xf32> to vector<16x128xf32>
    %23 = arith.addf %20, %22 : vector<16x128xf32>
    %cst_25 = arith.constant 0.000000e+00 : f32
    %24 = vector.broadcast %cst_25 : f32 to vector<16x128xf32>
    %25 = arith.maximumf %23, %24 : vector<16x128xf32>
    %c1_26 = arith.constant 1 : index
    %c0_27 = arith.constant 0 : index
    %26 = vector.load %arg10[%c1_26, %c0_27] : memref<18x512xf32, #tpu.memory_space<vmem>>, vector<16x128xf32>
    tpu.vector_store %arg10[%c1_26, %c0_27], %25 {strides = array<i32>} : memref<18x512xf32, #tpu.memory_space<vmem>>, vector<16x128xf32>,
    %cst_28 = arith.constant 0.000000e+00 : f32
    %27 = vector.broadcast %cst_28 : f32 to vector<16x256xf32>
    %c0_29 = arith.constant 0 : index
    %c0_30 = arith.constant 0 : index
    %28 = vector.load %arg10[%c0_29, %c0_30] : memref<18x512xf32, #tpu.memory_space<vmem>>, vector<16x128xf32>
    %c0_31 = arith.constant 0 : index
    %c0_32 = arith.constant 0 : index
    %c0_33 = arith.constant 0 : index
    %29 = vector.load %arg4[%c0_31, %c0_32, %c0_33] : memref<3x128x256xf32, #tpu.memory_space<vmem>>, vector<1x128x256xf32>
    %30 = vector.shape_cast %29 : vector<1x128x256xf32> to vector<128x256xf32>
    %cst_34 = arith.constant dense<0.000000e+00> : vector<16x256xf32>
    %31 = tpu.matmul %28, %30, %cst_34 {dimension_numbers = #tpu.dot_dimension_numbers<[1], [0], [0], [1], [0, 0, 1, 1], [], []>} : vector<16x128xf32>, vector<128x256xf32>, vector<16x256xf32> -> vector<16x256xf32>
    %32 = arith.addf %27, %31 : vector<16x256xf32>
    %c1_35 = arith.constant 1 : index
    %c0_36 = arith.constant 0 : index
    %33 = vector.load %arg10[%c1_35, %c0_36] : memref<18x512xf32, #tpu.memory_space<vmem>>, vector<16x128xf32>
    %c1_37 = arith.constant 1 : index
    %c0_38 = arith.constant 0 : index
    %c0_39 = arith.constant 0 : index
    %34 = vector.load %arg4[%c1_37, %c0_38, %c0_39] : memref<3x128x256xf32, #tpu.memory_space<vmem>>, vector<1x128x256xf32>
    %35 = vector.shape_cast %34 : vector<1x128x256xf32> to vector<128x256xf32>
    %cst_40 = arith.constant dense<0.000000e+00> : vector<16x256xf32>
    %36 = tpu.matmul %33, %35, %cst_40 {dimension_numbers = #tpu.dot_dimension_numbers<[1], [0], [0], [1], [0, 0, 1, 1], [], []>} : vector<16x128xf32>, vector<128x256xf32>, vector<16x256xf32> -> vector<16x256xf32>
    %37 = arith.addf %32, %36 : vector<16x256xf32>
    %c2_41 = arith.constant 2 : index
    %c0_42 = arith.constant 0 : index
    %38 = vector.load %arg10[%c2_41, %c0_42] : memref<18x512xf32, #tpu.memory_space<vmem>>, vector<16x128xf32>
    %c2_43 = arith.constant 2 : index
    %c0_44 = arith.constant 0 : index
    %c0_45 = arith.constant 0 : index
    %39 = vector.load %arg4[%c2_43, %c0_44, %c0_45] : memref<3x128x256xf32, #tpu.memory_space<vmem>>, vector<1x128x256xf32>
    %40 = vector.shape_cast %39 : vector<1x128x256xf32> to vector<128x256xf32>
    %cst_46 = arith.constant dense<0.000000e+00> : vector<16x256xf32>
    %41 = tpu.matmul %38, %40, %cst_46 {dimension_numbers = #tpu.dot_dimension_numbers<[1], [0], [0], [1], [0, 0, 1, 1], [], []>} : vector<16x128xf32>, vector<128x256xf32>, vector<16x256xf32> -> vector<16x256xf32>
    %42 = arith.addf %37, %41 : vector<16x256xf32>
    %c0_47 = arith.constant 0 : index
    %c0_48 = arith.constant 0 : index
    %43 = vector.load %arg5[%c0_47, %c0_48] : memref<1x256xf32, #tpu.memory_space<vmem>>, vector<1x256xf32>
    %44 = vector.broadcast %43 : vector<1x256xf32> to vector<16x256xf32>
    %45 = arith.addf %42, %44 : vector<16x256xf32>
    %cst_49 = arith.constant 0.000000e+00 : f32
    %46 = vector.broadcast %cst_49 : f32 to vector<16x256xf32>
    %47 = arith.maximumf %45, %46 : vector<16x256xf32>
    %c0_50 = arith.constant 0 : index
    %c0_51 = arith.constant 0 : index
    %c0_52 = arith.constant 0 : index
    %48 = vector.load %arg8[%c0_50, %c0_51, %c0_52] : memref<1x16x256xf32, #tpu.memory_space<vmem>>, vector<1x16x256xf32>
    %49 = vector.shape_cast %48 : vector<1x16x256xf32> to vector<16x256xf32>
    %50 = vector.shape_cast %47 : vector<16x256xf32> to vector<1x16x256xf32>
    tpu.vector_store %arg8[%c0_50, %c0_51, %c0_52], %50 {strides = array<i32>} : memref<1x16x256xf32, #tpu.memory_space<vmem>>, vector<1x16x256xf32>,
    %c1_53 = arith.constant 1 : index
    %c0_54 = arith.constant 0 : index
    %51 = vector.load %arg10[%c1_53, %c0_54] : memref<18x512xf32, #tpu.memory_space<vmem>>, vector<16x256xf32>
    tpu.vector_store %arg10[%c1_53, %c0_54], %47 {strides = array<i32>} : memref<18x512xf32, #tpu.memory_space<vmem>>, vector<16x256xf32>,
    %cst_55 = arith.constant 0.000000e+00 : f32
    %52 = vector.broadcast %cst_55 : f32 to vector<16x512xf32>
    %c0_56 = arith.constant 0 : index
    %c0_57 = arith.constant 0 : index
    %53 = vector.load %arg10[%c0_56, %c0_57] : memref<18x512xf32, #tpu.memory_space<vmem>>, vector<16x256xf32>
    %c0_58 = arith.constant 0 : index
    %c0_59 = arith.constant 0 : index
    %c0_60 = arith.constant 0 : index
    %54 = vector.load %arg6[%c0_58, %c0_59, %c0_60] : memref<3x256x512xf32, #tpu.memory_space<vmem>>, vector<1x256x512xf32>
    %55 = vector.shape_cast %54 : vector<1x256x512xf32> to vector<256x512xf32>
    %cst_61 = arith.constant dense<0.000000e+00> : vector<16x512xf32>
    %56 = tpu.matmul %53, %55, %cst_61 {dimension_numbers = #tpu.dot_dimension_numbers<[1], [0], [0], [1], [0, 0, 1, 1], [], []>} : vector<16x256xf32>, vector<256x512xf32>, vector<16x512xf32> -> vector<16x512xf32>
    %57 = arith.addf %52, %56 : vector<16x512xf32>
    %c1_62 = arith.constant 1 : index
    %c0_63 = arith.constant 0 : index
    %58 = vector.load %arg10[%c1_62, %c0_63] : memref<18x512xf32, #tpu.memory_space<vmem>>, vector<16x256xf32>
    %c1_64 = arith.constant 1 : index
    %c0_65 = arith.constant 0 : index
    %c0_66 = arith.constant 0 : index
    %59 = vector.load %arg6[%c1_64, %c0_65, %c0_66] : memref<3x256x512xf32, #tpu.memory_space<vmem>>, vector<1x256x512xf32>
    %60 = vector.shape_cast %59 : vector<1x256x512xf32> to vector<256x512xf32>
    %cst_67 = arith.constant dense<0.000000e+00> : vector<16x512xf32>
    %61 = tpu.matmul %58, %60, %cst_67 {dimension_numbers = #tpu.dot_dimension_numbers<[1], [0], [0], [1], [0, 0, 1, 1], [], []>} : vector<16x256xf32>, vector<256x512xf32>, vector<16x512xf32> -> vector<16x512xf32>
    %62 = arith.addf %57, %61 : vector<16x512xf32>
    %c2_68 = arith.constant 2 : index
    %c0_69 = arith.constant 0 : index
    %63 = vector.load %arg10[%c2_68, %c0_69] : memref<18x512xf32, #tpu.memory_space<vmem>>, vector<16x256xf32>
    %c2_70 = arith.constant 2 : index
    %c0_71 = arith.constant 0 : index
    %c0_72 = arith.constant 0 : index
    %64 = vector.load %arg6[%c2_70, %c0_71, %c0_72] : memref<3x256x512xf32, #tpu.memory_space<vmem>>, vector<1x256x512xf32>
    %65 = vector.shape_cast %64 : vector<1x256x512xf32> to vector<256x512xf32>
    %cst_73 = arith.constant dense<0.000000e+00> : vector<16x512xf32>
    %66 = tpu.matmul %63, %65, %cst_73 {dimension_numbers = #tpu.dot_dimension_numbers<[1], [0], [0], [1], [0, 0, 1, 1], [], []>} : vector<16x256xf32>, vector<256x512xf32>, vector<16x512xf32> -> vector<16x512xf32>
    %67 = arith.addf %62, %66 : vector<16x512xf32>
    %c0_74 = arith.constant 0 : index
    %c0_75 = arith.constant 0 : index
    %68 = vector.load %arg7[%c0_74, %c0_75] : memref<1x512xf32, #tpu.memory_space<vmem>>, vector<1x512xf32>
    %69 = vector.broadcast %68 : vector<1x512xf32> to vector<16x512xf32>
    %70 = arith.addf %67, %69 : vector<16x512xf32>
    %cst_76 = arith.constant 0.000000e+00 : f32
    %71 = vector.broadcast %cst_76 : f32 to vector<16x512xf32>
    %72 = arith.maximumf %70, %71 : vector<16x512xf32>
    %c0_77 = arith.constant 0 : index
    %c0_78 = arith.constant 0 : index
    %c0_79 = arith.constant 0 : index
    %73 = vector.load %arg9[%c0_77, %c0_78, %c0_79] : memref<1x16x512xf32, #tpu.memory_space<vmem>>, vector<1x16x512xf32>
    %74 = vector.shape_cast %73 : vector<1x16x512xf32> to vector<16x512xf32>
    %75 = vector.shape_cast %72 : vector<16x512xf32> to vector<1x16x512xf32>
    tpu.vector_store %arg9[%c0_77, %c0_78, %c0_79], %75 {strides = array<i32>} : memref<1x16x512xf32, #tpu.memory_space<vmem>>, vector<1x16x512xf32>,
    return
  }
  func.func @transform_0(%arg0: i32) -> (i32, i32, i32) {
    %c0_i32 = arith.constant 0 : i32
    %c0_i32_0 = arith.constant 0 : i32
    %c0_i32_1 = arith.constant 0 : i32
    return %arg0, %c0_i32, %c0_i32_0 : i32, i32, i32
  }
  func.func @transform_1(%arg0: i32) -> (i32, i32, i32) {
    %c0_i32 = arith.constant 0 : i32
    %c0_i32_0 = arith.constant 0 : i32
    %c0_i32_1 = arith.constant 0 : i32
    %c0_i32_2 = arith.constant 0 : i32
    return %c0_i32, %c0_i32_0, %c0_i32_1 : i32, i32, i32
  }
  func.func @transform_2(%arg0: i32) -> (i32, i32) {
    %c0_i32 = arith.constant 0 : i32
    %c0_i32_0 = arith.constant 0 : i32
    %c0_i32_1 = arith.constant 0 : i32
    return %c0_i32, %c0_i32_0 : i32, i32
  }
  func.func @transform_3(%arg0: i32) -> (i32, i32, i32) {
    %c0_i32 = arith.constant 0 : i32
    %c0_i32_0 = arith.constant 0 : i32
    %c0_i32_1 = arith.constant 0 : i32
    %c0_i32_2 = arith.constant 0 : i32
    return %c0_i32, %c0_i32_0, %c0_i32_1 : i32, i32, i32
  }
  func.func @transform_4(%arg0: i32) -> (i32, i32) {
    %c0_i32 = arith.constant 0 : i32
    %c0_i32_0 = arith.constant 0 : i32
    %c0_i32_1 = arith.constant 0 : i32
    return %c0_i32, %c0_i32_0 : i32, i32
  }
  func.func @transform_5(%arg0: i32) -> (i32, i32, i32) {
    %c0_i32 = arith.constant 0 : i32
    %c0_i32_0 = arith.constant 0 : i32
    %c0_i32_1 = arith.constant 0 : i32
    %c0_i32_2 = arith.constant 0 : i32
    return %c0_i32, %c0_i32_0, %c0_i32_1 : i32, i32, i32
  }
  func.func @transform_6(%arg0: i32) -> (i32, i32) {
    %c0_i32 = arith.constant 0 : i32
    %c0_i32_0 = arith.constant 0 : i32
    %c0_i32_1 = arith.constant 0 : i32
    return %c0_i32, %c0_i32_0 : i32, i32
  }
  func.func @transform_7(%arg0: i32) -> (i32, i32, i32) {
    %c0_i32 = arith.constant 0 : i32
    %c0_i32_0 = arith.constant 0 : i32
    %c0_i32_1 = arith.constant 0 : i32
    return %arg0, %c0_i32, %c0_i32_0 : i32, i32, i32
  }
  func.func @transform_8(%arg0: i32) -> (i32, i32, i32) {
    %c0_i32 = arith.constant 0 : i32
    %c0_i32_0 = arith.constant 0 : i32
    %c0_i32_1 = arith.constant 0 : i32
    return %arg0, %c0_i32, %c0_i32_0 : i32, i32, i32
  }
}

</mosaic_0001>

<bundles_post_ra>
// kernel: tpu_custom_call.1
= control target key start
LH: loop header
LB: loop body
LE: loop exit
PB: predicated region body
PF: predicated region fallthrough
CT: control target
= control target key end

     0   :  { %s3937_s0 = inlined_call_operand.hbm [shape: f32[2,16,64], index: 0, kind: input, shape index: {}]   ;;  %s3938_s1 = inlined_call_operand.hbm [shape: f32[3,64,128], index: 1, kind: input, shape index: {}]   ;;  %s3939_s2 = inlined_call_operand.hbm [shape: f32[1,128], index: 2, kind: input, shape index: {}]   ;;  %s3940_s3 = inlined_call_operand.hbm [shape: f32[3,128,256], index: 3, kind: input, shape index: {}]   ;;  %s3941_s4 = inlined_call_operand.hbm [shape: f32[1,256], index: 4, kind: input, shape index: {}]   ;;  %s3942_s5 = inlined_call_operand.hbm [shape: f32[3,256,512], index: 5, kind: input, shape index: {}]   ;;  %s3943_s6 = inlined_call_operand.hbm [shape: f32[1,512], index: 6, kind: input, shape index: {}]   ;;  %s3944_s7 = inlined_call_operand.hbm [shape: f32[2,16,256], index: 7, kind: output, shape index: {0}]   ;;  %s3945_s8 = inlined_call_operand.hbm [shape: f32[2,16,512], index: 8, kind: output, shape index: {1}]  }
   0x1   :  { %3951 = sst [smem:[#allocation24_spill]] %s3938_s1 }
   0x2   :  { %3952 = sst [smem:[#allocation25_spill]] %s3940_s3 }
   0x3   :  { %14 = vsyncpa [#allocation4], 0 }
   0x4   :  { %16 = vsyncpa [#allocation4 + $0x1], 0 }
   0x5   :  { %17 = vsyncpa [#allocation7], 0 }
   0x6   :  { %18 = vsyncpa [#allocation10], 0 }
   0x7   :  { %19 = vsyncpa [#allocation13], 0 }
   0x8   :  { %20 = vsyncpa [#allocation5], 0 }
   0x9   :  { %22 = vsyncpa [#allocation5 + $0x1], 0 }
   0xa   :  { %23 = vsyncpa [#allocation17], 0 }
   0xb   :  { %25 = vsyncpa [#allocation17 + $0x1], 0  ;;  %s3491_s27 = smov 0   ;;  %s3493_s28 = smov 0  }
   0xc   :  { %s3495_s29 = smov 0   ;;  %s3497_s30 = smov 0  }
   0xd LB: > { %s3426_s9 = smov [#allocation6]   ;;  %s3512_s11 = sadd.s32 4294967295, %s3424_s30   ;;  %s3424_s30 = sphi %s3497_s30, %s3979_s30   ;;  %s3420_s29 = sphi %s3495_s29, %s3978_s29   ;;  %s3416_s28 = sphi %s3493_s28, %s3977_s28   ;;  %s3412_s27 = sphi %s3491_s27, %s3976_s27  }
   0xe   : > { %s252_s10 = sshll.u32 %s3426_s9, 4  ;;  %p2310_p0 = scmp.ge.s32.totalorder %s3424_s30, 1  ;;  %s3517_s10 = int_to_ptr.vmem [resolvable:$true] %s252_s10 }
   0xf   : > { %p3947_p1 = scmp.eq.s32.totalorder %s3512_s11, 0  ;;  %p240_p2 = scmp.lt.s32.totalorder %s3424_s30, 3 }
  0x10   : > { %s3427_s13 = smov [#allocation9]   ;;  %s3428_s16 = smov [#allocation12]  }
  0x11   : > { %p3519_p3 = pnand %p2310_p0, %p240_p2  ;;  %s276_s14 = sshll.u32 %s3427_s13, 4  ;;  %s3532_s14 = int_to_ptr.vmem [resolvable:$true] %s276_s14 }
  0x12   : > { %s3534_s17 = sshll.u32 %s3428_s16, 4  ;;  %s3955_s1 = sld [smem:[#allocation24_spill]]  ;;  %s301_s17 = int_to_ptr.vmem [resolvable:$true] %s3534_s17 }
  0x13   : > { %s3953_s12 = scalar_select %p3519_p3, 1, 0 }
  0x14   : > { %p3022_p5 = pneg %p3519_p3 }
  0x16   : > { %p3528_p6 = pnand %p3022_p5, %p3947_p1 }
  0x18   : > { %s3116_s20 = scalar_lea.hbm %s3955_s1, 3072  ;;  %p3544_p8 = pneg %p3528_p6 }
  0x19   : > { %p3117_p7 = scmp.ne.s32.totalorder %s3955_s1, %s3116_s20  ;;  %p3123_p11 = scmp.lt.u32.totalorder %s3116_s20, %s3955_s1 }
  0x1b   : > { %p3119_p9 = pnand %p3544_p8, %p3117_p7 }
  0x1d   : > { %p3120_p10 = pneg %p3119_p9 }
  0x1f   : > { %p3125_p12 = pnand %p3123_p11, %p3120_p10 }
  0x21   : > { %3128 = shalt.err (!%p3125_p12)
}
  0x22   : > { %s3129_s26 = scalar_lea.vmem %s3517_s10, 3072  ;;  %p3137_p5 = scmp.lt.s32.totalorder %s3517_s10, %s3517_s10 }
  0x23   : > { %p3130_p13 = scmp.ne.s32.totalorder %s3517_s10, %s3129_s26  ;;  %p3138_p4 = scmp.lt.s32.totalorder %s3129_s26, %s3129_s26 }
  0x25   : > { %p3132_p0 = pnand %p3130_p13, %p3544_p8  ;;  %p3139_p7 = por %p3138_p4, %p3137_p5 }
  0x27   : > { %p3133_p2 = pneg %p3132_p0 }
  0x29   : > { %p3140_p9 = pnand %p3139_p7, %p3133_p2 }
  0x2b   : > { %3143 = shalt.err (!%p3140_p9)
}
  0x2c   : > { %s3946_s9 = smov 128   ;;  %s3949_s13 = smov 8  }
  0x2d   : > { %3025 = dma.hbm_to_vmem [thread:$0]  (!%p3528_p6), %s3955_s1, 3072, %s3517_s10, [#allocation7], %s3946_s9, %s3946_s9, %s3949_s13  }
  0x2e   : > { %s3957_s3 = sld [smem:[#allocation25_spill]] }
  0x34   : > { %s3144_s21 = scalar_lea.hbm %s3957_s3, 12288 }
  0x35   : > { %p3145_p4 = scmp.ne.s32.totalorder %s3957_s3, %s3144_s21  ;;  %p3151_p12 = scmp.lt.u32.totalorder %s3144_s21, %s3957_s3 }
  0x37   : > { %p3147_p10 = pnand %p3145_p4, %p3544_p8 }
  0x39   : > { %p3148_p11 = pneg %p3147_p10 }
  0x3b   : > { %p3153_p13 = pnand %p3151_p12, %p3148_p11 }
  0x3d   : > { %3156 = shalt.err (!%p3153_p13)
}
  0x3e   : > { %s3157_s10 = scalar_lea.vmem %s3532_s14, 12288  ;;  %p3165_p7 = scmp.lt.s32.totalorder %s3532_s14, %s3532_s14 }
  0x3f   : > { %p3158_p0 = scmp.ne.s32.totalorder %s3532_s14, %s3157_s10  ;;  %p3166_p9 = scmp.lt.s32.totalorder %s3157_s10, %s3157_s10 }
  0x41   : > { %p3160_p2 = pnand %p3158_p0, %p3544_p8  ;;  %p3167_p4 = por %p3166_p9, %p3165_p7 }
  0x43   : > { %p3161_p5 = pneg %p3160_p2 }
  0x45   : > { %p3168_p10 = pnand %p3167_p4, %p3161_p5 }
  0x47   : > { %3171 = shalt.err (!%p3168_p10)
}
  0x48   : > { %s3431_s16 = smov 256   ;;  %s3432_s18 = smov 16  }
  0x49   : > { %3031 = dma.hbm_to_vmem [thread:$0]  (!%p3528_p6), %s3957_s3, 12288, %s3532_s14, [#allocation10], %s3431_s16, %s3431_s16, %s3432_s18  }
  0x4a   : > { %s3172_s24 = scalar_lea.hbm %s3942_s5, 49152 }
  0x4b   : > { %p3173_p11 = scmp.ne.s32.totalorder %s3942_s5, %s3172_s24  ;;  %p3179_p0 = scmp.lt.u32.totalorder %s3172_s24, %s3942_s5 }
  0x4d   : > { %p3175_p12 = pnand %p3173_p11, %p3544_p8 }
  0x4f   : > { %p3176_p13 = pneg %p3175_p12 }
  0x51   : > { %p3181_p2 = pnand %p3179_p0, %p3176_p13 }
  0x53   : > { %3184 = shalt.err (!%p3181_p2)
}
  0x54   : > { %s3185_s19 = scalar_lea.vmem %s301_s17, 49152  ;;  %p3193_p4 = scmp.lt.s32.totalorder %s301_s17, %s301_s17 }
  0x55   : > { %p3186_p5 = scmp.ne.s32.totalorder %s301_s17, %s3185_s19  ;;  %p3194_p10 = scmp.lt.s32.totalorder %s3185_s19, %s3185_s19 }
  0x57   : > { %p3188_p7 = pnand %p3186_p5, %p3544_p8  ;;  %p3195_p1 = por %p3194_p10, %p3193_p4 }
  0x59   : > { %p3189_p9 = pneg %p3188_p7 }
  0x5b   : > { %p3196_p3 = pnand %p3195_p1, %p3189_p9 }
  0x5d   : > { %3199 = shalt.err (!%p3196_p3)
}
  0x5e   : > { %s3433_s14 = smov 512   ;;  %s3434_s16 = smov 32  }
  0x5f   : > { %3037 = dma.hbm_to_vmem [thread:$0]  (!%p3528_p6), %s3942_s5, 49152, %s301_s17, [#allocation13], %s3433_s14, %s3433_s14, %s3434_s16  }
  0x60   : > { %s3435_s20 = smov [#allocation8]   ;;  %s3436_s22 = smov [#allocation11]  }
  0x61   : > { %s266_s21 = sshll.u32 %s3435_s20, 4  ;;  %s290_s24 = sshll.u32 %s3436_s22, 4  ;;  %s267_s21 = int_to_ptr.vmem [resolvable:$true] %s266_s21  ;;  %s291_s24 = int_to_ptr.vmem [resolvable:$true] %s290_s24 }
  0x62   : > { %s3200_s10 = scalar_lea.hbm %s3939_s2, 16 }
  0x63   : > { %p3201_p1 = scmp.ne.s32.totalorder %s3939_s2, %s3200_s10  ;;  %p3207_p12 = scmp.lt.u32.totalorder %s3200_s10, %s3939_s2 }
  0x65   : > { %p3203_p3 = pnand %p3201_p1, %p3544_p8 }
  0x67   : > { %p3204_p11 = pneg %p3203_p3 }
  0x69   : > { %p3209_p13 = pnand %p3207_p12, %p3204_p11 }
  0x6b   : > { %3212 = shalt.err (!%p3209_p13)
}
  0x6c   : > { %s3213_s17 = scalar_lea.vmem %s267_s21, 16  ;;  %s3220_s14 = scalar_lea.vmem %s267_s21, 32 }
  0x6d   : > { %p3214_p0 = scmp.ne.s32.totalorder %s267_s21, %s3213_s17  ;;  %p3221_p7 = scmp.lt.s32.totalorder %s267_s21, %s267_s21 }
  0x6e   : > { %p3222_p9 = scmp.lt.s32.totalorder %s3220_s14, %s3213_s17 }
  0x6f   : > { %p3216_p2 = pnand %p3214_p0, %p3544_p8 }
  0x70   : > { %p3223_p4 = por %p3222_p9, %p3221_p7 }
  0x71   : > { %p3217_p5 = pneg %p3216_p2 }
  0x73   : > { %p3224_p10 = pnand %p3223_p4, %p3217_p5 }
  0x75   : > { %3227 = shalt.err (!%p3224_p10)
}
  0x76   : > { %3028 = dma.hbm_to_vmem [thread:$0]  (!%p3528_p6), %s3939_s2, 16, %s267_s21, [#allocation7]  }
  0x77   : > { %s3228_s9 = scalar_lea.hbm %s3941_s4, 32 }
  0x78   : > { %p3229_p1 = scmp.ne.s32.totalorder %s3941_s4, %s3228_s9  ;;  %p3235_p12 = scmp.lt.u32.totalorder %s3228_s9, %s3941_s4 }
  0x7a   : > { %p3231_p3 = pnand %p3229_p1, %p3544_p8 }
  0x7c   : > { %p3232_p11 = pneg %p3231_p3 }
  0x7e   : > { %p3237_p13 = pnand %p3235_p12, %p3232_p11 }
  0x80   : > { %3240 = shalt.err (!%p3237_p13)
}
  0x81   : > { %s3241_s26 = scalar_lea.vmem %s291_s24, 32  ;;  %p3249_p7 = scmp.lt.s32.totalorder %s291_s24, %s291_s24 }
  0x82   : > { %p3242_p0 = scmp.ne.s32.totalorder %s291_s24, %s3241_s26  ;;  %p3250_p9 = scmp.lt.s32.totalorder %s3241_s26, %s3241_s26 }
  0x84   : > { %p3244_p2 = pnand %p3242_p0, %p3544_p8  ;;  %p3251_p4 = por %p3250_p9, %p3249_p7 }
  0x86   : > { %p3245_p5 = pneg %p3244_p2 }
  0x88   : > { %p3252_p10 = pnand %p3251_p4, %p3245_p5 }
  0x8a   : > { %3255 = shalt.err (!%p3252_p10)
}
  0x8b   : > { %3034 = dma.hbm_to_vmem [thread:$0]  (!%p3528_p6), %s3941_s4, 32, %s291_s24, [#allocation10]  }
  0x8c   : > { %s3437_s19 = smov [#allocation14]   ;;  %s3256_s16 = scalar_lea.hbm %s3943_s6, 64 }
  0x8d   : > { %s314_s17 = sshll.u32 %s3437_s19, 4  ;;  %p3257_p1 = scmp.ne.s32.totalorder %s3943_s6, %s3256_s16  ;;  %s315_s17 = int_to_ptr.vmem [resolvable:$true] %s314_s17 }
  0x8e   : > { %p3263_p12 = scmp.lt.u32.totalorder %s3256_s16, %s3943_s6 }
  0x8f   : > { %p3259_p3 = pnand %p3257_p1, %p3544_p8 }
  0x91   : > { %p3260_p11 = pneg %p3259_p3 }
  0x93   : > { %p3265_p13 = pnand %p3263_p12, %p3260_p11 }
  0x95   : > { %3268 = shalt.err (!%p3265_p13)
}
  0x96   : > { %s3269_s24 = scalar_lea.vmem %s315_s17, 64  ;;  %p3277_p7 = scmp.lt.s32.totalorder %s315_s17, %s315_s17 }
  0x97   : > { %p3270_p0 = scmp.ne.s32.totalorder %s315_s17, %s3269_s24  ;;  %p3278_p9 = scmp.lt.s32.totalorder %s3269_s24, %s3269_s24 }
  0x99   : > { %p3272_p2 = pnand %p3270_p0, %p3544_p8  ;;  %p3279_p4 = por %p3278_p9, %p3277_p7 }
  0x9b   : > { %p3273_p5 = pneg %p3272_p2 }
  0x9d   : > { %p3280_p10 = pnand %p3279_p4, %p3273_p5 }
  0x9f   : > { %3283 = shalt.err (!%p3280_p10)
}
  0xa0   : > { %3040 = dma.hbm_to_vmem [thread:$0]  (!%p3528_p6), %s3943_s6, 64, %s315_s17, [#allocation13]  }
  0xa1   : > { %s2309_s23 = sadd.s32 4294967294, %s3424_s30   ;;  %s3666_s15 = sadd.s32 1, %s3424_s30  }
  0xa2   : > { %s35_s25 = ssub.s32 %s3424_s30, %s3666_s15  ;;  %s38_s26 = sadd.s32 1, %s3420_s29 }
  0xa3   : > { %p36_p8 = scmp.eq.s32.totalorder %s35_s25, 0  ;;  %p45_p1 = scmp.ne.s32.totalorder %s3420_s29, %s3416_s28 }
  0xa4   : > { %p46_p3 = scmp.eq.s32.totalorder %s3424_s30, 0  ;;  %p51_p11 = scmp.ne.s32.totalorder %s3416_s28, %s3412_s27 }
  0xa5   : > { %s3677_s21 = scalar_select %p36_p8, %s3420_s29, %s38_s26  }
  0xa6   : > { %p3679_p12 = por %p46_p3, %p45_p1  ;;  %p3959_p13 = scmp.eq.s32.totalorder %s3512_s11, 0 }
  0xa7   : > { %p201_p0 = scmp.eq.s32.totalorder %s3512_s11, 1  ;;  %p207_p2 = scmp.eq.s32.totalorder %s2309_s23, 1 }
  0xa8   : > { %p3685_p6 = por %p3959_p13, %p51_p11  ;;  %p3058_p5 = scmp.lt.s32.totalorder %s3424_s30, 2 }
  0xa9   : > { %s325_s17 = sand.u32 1, %s3420_s29   ;;  %p3692_p7 = por %p201_p0, %p45_p1 }
  0xaa   : > { %p3696_p9 = por %p207_p2, %p51_p11  ;;  %s2318_s16 = sshll.u32 %s325_s17, 4 }
  0xab   : > { %s3961_s14 = scalar_select %p3692_p7, 1, 0 }
  0xac   : > { %s3962_s13 = scalar_select %p3696_p9, 1, 0 }
  0xad   : > { %s2346_s1 = sshll.u32 %s3424_s30, 8  ;;  %s329_s24 = scalar_lea.vmem [#allocation3], %s2318_s16 }
  0xae   : > { %s3704_s18 = scalar_lea.hbm %s3937_s0, %s2346_s1  ;;  %s336_s20 = sshll.u32 %s329_s24, 4  ;;  %s3706_s20 = int_to_ptr.vmem [resolvable:$true] %s336_s20 }
  0xaf   : > { %p3710_p4 = pnand %p3058_p5, %p3679_p12  ;;  %s3714_s23 = scalar_lea.sflag [#allocation4], %s325_s17 }
  0xb0   : > { %s3284_s25 = scalar_lea.hbm %s3704_s18, 256  ;;  %s3289_s10 = scalar_lea.hbm %s3937_s0, 512 }
  0xb1   : > { %p3285_p10 = scmp.ne.s32.totalorder %s3704_s18, %s3284_s25  ;;  %p3286_p8 = pneg %p3710_p4 }
  0xb2   : > { %p3290_p11 = scmp.lt.u32.totalorder %s3704_s18, %s3937_s0  ;;  %p3291_p12 = scmp.lt.u32.totalorder %s3289_s10, %s3284_s25 }
  0xb3   : > { %p3287_p1 = pnand %p3286_p8, %p3285_p10  ;;  %p3293_p0 = scmp.lt.u32.totalorder %s3284_s25, %s3704_s18 }
  0xb4   : > { %p3292_p13 = por %p3291_p12, %p3290_p11 }
  0xb5   : > { %p3288_p3 = pneg %p3287_p1 }
  0xb6   : > { %p3294_p2 = por %p3293_p0, %p3292_p13 }
  0xb8   : > { %p3295_p5 = pnand %p3294_p2, %p3288_p3 }
  0xba   : > { %3298 = shalt.err (!%p3295_p5)
}
  0xbb   : > { %s3299_s17 = scalar_lea.vmem %s3706_s20, 256  ;;  %s3438_s9 = smov [#allocation3]  }
  0xbc   : > { %p3300_p10 = scmp.ne.s32.totalorder %s3706_s20, %s3299_s17  ;;  %s3304_s24 = sshll.u32 %s3438_s9, 4  ;;  %s3305_s24 = int_to_ptr.vmem [resolvable:$false] %s3304_s24 }
  0xbd   : > { %s3306_s26 = scalar_lea.vmem %s3305_s24, 512  ;;  %p3307_p7 = scmp.lt.s32.totalorder %s3706_s20, %s3305_s24 }
  0xbe   : > { %p3302_p1 = pnand %p3300_p10, %p3286_p8  ;;  %p3308_p11 = scmp.lt.s32.totalorder %s3306_s26, %s3299_s17 }
  0xc0   : > { %p3303_p9 = pneg %p3302_p1  ;;  %p3309_p12 = por %p3308_p11, %p3307_p7 }
  0xc2   : > { %p3310_p13 = pnand %p3309_p12, %p3303_p9 }
  0xc4   : > { %3313 = shalt.err (!%p3310_p13)
}
  0xc5   : > { %s3964_s25 = smov 8   ;;  %s3965_s16 = smov 128  }
  0xc6   : > { %3044 = dma.hbm_to_vmem [thread:$0]  (!%p3710_p4), %s3704_s18, 256, %s3706_s20, %s3714_s23, %s3965_s16, %s3965_s16, %s3964_s25  }
  0xc7   : > { %p3966_p8 = scmp.ne.s32.totalorder %s3953_s12, 0 }
  0xc8   : > { %s3748_s10 = sand.u32 (!%p3966_p8), 1, %s3416_s28  }
  0xc9   : > { %348 = sbr.rel (%p3966_p8) target bundleno = 1127 (0x467), region = 48  ;;  %s2322_s1 = sshll.u32 (!%p3966_p8), %s3748_s10, 4 }
  0xca   : > { %s351_s3 = scalar_lea.sflag (!%p3966_p8), [#allocation4], %s3748_s10  ;;  %s354_s17 = scalar_lea.vmem (!%p3966_p8), [#allocation3], %s2322_s1 }
  0xd0   : > { %3387 = dma.done.wait (%p3685_p6), %s351_s3, 256  }
  0xd1   : > { %3389 = vsyncadd (%p3685_p6), %s351_s3, 4294967040  ;;  %p3967_p7 = scmp.eq.s32.totalorder %s3512_s11, 0 }
  0xd3   : > { %3391 = dma.done.wait (%p3967_p7), [#allocation7], 3088   ;;  %p3968_p9 = pmov %p3967_p7 }
  0xd4   : > { %p3969_p4 = pmov %p3967_p7 }
  0xd5   : > { %3393 = vsyncadd (%p3968_p9), [#allocation7], 4294964208 }
  0xd6   : > { %3395 = dma.done.wait (%p3969_p4), [#allocation10], 12320   ;;  %p3970_p3 = pmov %p3969_p4 }
  0xd8   : > { %3397 = vsyncadd (%p3970_p3), [#allocation10], 4294954976  ;;  %p3971_p0 = pmov %p3970_p3 }
  0xda   : > { %3399 = dma.done.wait (%p3971_p0), [#allocation13], 49216   ;;  %p3972_p2 = pmov %p3971_p0 }
  0xdb   : > { %v3439_v0 = vmov 0.0   ;;  %v458_v1 = vld [vmem:[#allocation6 + $0x40] sm:$0xff]  ;;  %v459_v2 = vld [vmem:[#allocation6 + $0x48] sm:$0xff]  ;;  %v460_v3 = vld [vmem:[#allocation6 + $0x50] sm:$0xff]  ;;  %vm439_vm0 = vcmask 523265   ;;  %vm432_vm1 = vcmask 1040384  }
  0xdc   : > { %3401 = vsyncadd (%p3972_p2), [#allocation13], 4294918080  ;;  %416 = vst [vmem:[#allocation2] sm:$0xff] %v3439_v0  ;;  %976 = vmatprep.mubr.f32.mxu1 %v3439_v0  ;;  %v2436_v4 = vpack.c.bf16 %v459_v2, %v458_v1  ;;  %v461_v5 = vld [vmem:[#allocation6 + $0x58] sm:$0xff]  ;;  %v462_v7 = vld [vmem:[#allocation6 + $0x60] sm:$0xff]  ;;  %vm443_vm2 = vcmask 516096  }
  0xdd   : > { %420 = vst [vmem:[#allocation2 + $0x20] sm:$0xff] %v3439_v0  ;;  %424 = vst [vmem:[#allocation2 + $0x40] sm:$0x3] %v3439_v0  ;;  %v2440_v6 = vpack.c.bf16 %v461_v5, %v460_v3  ;;  %v463_v8 = vld [vmem:[#allocation6 + $0x68] sm:$0xff]  ;;  %v428_v9 = vld [vmem:[%s354_s17] sm:$0xff]  ;;  %vm441_vm3 = vcmask 523264  }
  0xde   : > { %417 = vst [vmem:[#allocation2 + $0x8] sm:$0xff] %v3439_v0  ;;  %425 = vst [vmem:[#allocation2 + $0x48] sm:$0x3] %v3439_v0  ;;  %2437 = vmatprep.subr.bf16.mxu0 %v2436_v4  ;;  %v429_v10 = vld [vmem:[%s354_s17 + $0x8] sm:$0xff]  ;;  %v433_v11 = vrot.slane %v428_v9, 7  ;;  %v2444_v13 = vpack.c.bf16 %v463_v8, %v462_v7  ;;  %v464_v14 = vld [vmem:[#allocation6 + $0x70] sm:$0xff] }
  0xdf   : > { %2439 = vmatpush3.bf16.msra.mxu0 %v2436_v4  ;;  %v434_v12 = vrot.slane %v429_v10, 7  ;;  %v465_v15 = vld [vmem:[#allocation6 + $0x78] sm:$0xff]  ;;  %v447_v17 = vld [vmem:[#allocation6] sm:$0xff]  ;;  %v759_v18 = vld [vmem:[#allocation9 + $0x8] sm:$0xff]  ;;  %vm469_vm4 = vcmask 1046528   ;;  %vm647_vm5 = vcmask 1045504  }
  0xe0   : > { %2441 = vmatprep.subr.bf16.mxu0 %v2440_v6  ;;  %440 = vst.msk [vmem:[#allocation2] sm:$0xfe] %vm439_vm0, %v433_v11  ;;  %v2448_v19 = vpack.c.bf16 %v465_v15, %v464_v14  ;;  %v761_v20 = vld [vmem:[#allocation9 + $0x18] sm:$0xff]  ;;  %v758_v21 = vld [vmem:[#allocation9] sm:$0xff]  ;;  %v760_v22 = vld [vmem:[#allocation9 + $0x10] sm:$0xff]  ;;  %s2329_s12 = sshll.u32 %s3748_s10, 5 }
  0xe1   : > { %v435_v16 = vsel %vm432_vm1, %v433_v11, %v434_v12  ;;  %444 = vst.msk [vmem:[#allocation2 + $0x40] sm:$0x1] %vm443_vm2, %v434_v12  ;;  %v448_v23 = vld [vmem:[#allocation6 + $0x8] sm:$0xff]  ;;  %v2516_v24 = vpack.c.bf16 %v761_v20, %v759_v18  ;;  %v2518_v25 = vpack.c.bf16 %v760_v22, %v758_v21  ;;  %v765_v27 = vld [vmem:[#allocation9 + $0x38] sm:$0xff]  ;;  %v764_v30 = vld [vmem:[#allocation9 + $0x30] sm:$0xff]  ;;  %s3815_s19 = scalar_lea.vmem [#allocation15], %s2329_s12 }
  0xe2   : > { %442 = vst.msk [vmem:[#allocation2 + $0x20] sm:$0xff] %vm441_vm3, %v435_v16  ;;  %v763_v26 = vld [vmem:[#allocation9 + $0x28] sm:$0xff]  ;;  %v762_v29 = vld [vmem:[#allocation9 + $0x20] sm:$0xff]  ;;  %v2452_v33 = vpack.c.bf16 %v448_v23, %v447_v17  ;;  %v450_v38 = vld [vmem:[#allocation6 + $0x18] sm:$0xff]  ;;  %s2131_s18 = sshll.u32 %s3815_s19, 4  ;;  %s2347_s20 = sshll.u32 %s3512_s11, 9  ;;  %s3848_s18 = int_to_ptr.vmem [resolvable:$true] %s2131_s18 }
  0xe3   : > { %2443 = vmatpush3.bf16.msra.mxu0 %v2440_v6  ;;  %v2520_v28 = vpack.c.bf16 %v765_v27, %v763_v26  ;;  %2517 = vmatprep.subr.bf16.mxu1 %v2516_v24  ;;  %v449_v37 = vld [vmem:[#allocation6 + $0x10] sm:$0xff]  ;;  %v2522_v39 = vpack.c.bf16 %v764_v30, %v762_v29  ;;  %v769_v42 = vld [vmem:[#allocation9 + $0x58] sm:$0xff]  ;;  %v766_v44 = vld [vmem:[#allocation9 + $0x40] sm:$0xff]  ;;  %s3854_s9 = scalar_lea.hbm %s3944_s7, %s2347_s20  ;;  %s2113_s24 = scalar_lea.sflag [#allocation5], %s3748_s10 }
  0xe4   : > { %2445 = vmatprep.subr.bf16.mxu0 %v2444_v13  ;;  %2519 = vmatpush1.bf16.msra.mxu1 %v2518_v25  ;;  %v767_v41 = vld [vmem:[#allocation9 + $0x48] sm:$0xff]  ;;  %v768_v45 = vld [vmem:[#allocation9 + $0x50] sm:$0xff]  ;;  %v2456_v48 = vpack.c.bf16 %v450_v38, %v449_v37  ;;  %v451_v51 = vld [vmem:[#allocation6 + $0x20] sm:$0xff]  ;;  %s3314_s26 = scalar_lea.vmem %s3848_s18, 512  ;;  %p3973_p5 = scmp.ne.s32.totalorder %s3961_s14, 0 }
  0xe5   : > { %2521 = vmatprep.subr.bf16.mxu1 %v2520_v28  ;;  %v2524_v43 = vpack.c.bf16 %v769_v42, %v767_v41  ;;  %v771_v50 = vld [vmem:[#allocation9 + $0x68] sm:$0xff]  ;;  %v2526_v53 = vpack.c.bf16 %v768_v45, %v766_v44  ;;  %v773_v54 = vld [vmem:[#allocation9 + $0x78] sm:$0xff]  ;;  %v770_v56 = vld [vmem:[#allocation9 + $0x60] sm:$0xff]  ;;  %p3315_p6 = scmp.ne.s32.totalorder %s3848_s18, %s3314_s26  ;;  %s3440_s25 = smov [#allocation15]  }
  0xe6   : > { %v452_v52 = vld [vmem:[#allocation6 + $0x28] sm:$0xff]  ;;  %v2528_v55 = vpack.c.bf16 %v773_v54, %v771_v50  ;;  %v772_v57 = vld [vmem:[#allocation9 + $0x70] sm:$0xff]  ;;  %v777_v59 = vld [vmem:[#allocation9 + $0x98] sm:$0xff]  ;;  %s3318_s16 = sshll.u32 %s3440_s25, 4  ;;  %s3319_s16 = int_to_ptr.vmem [resolvable:$false] %s3318_s16 }
  0xe7   : > { %2447 = vmatpush3.bf16.msra.mxu0 %v2444_v13  ;;  %v455_v31 = vld [vmem:[#allocation2] sm:$0xfe]  ;;  %v775_v58 = vld [vmem:[#allocation9 + $0x88] sm:$0xff]  ;;  %v2460_v60 = vpack.c.bf16 %v452_v52, %v451_v51  ;;  %v454_v62 = vld [vmem:[#allocation6 + $0x38] sm:$0xff]  ;;  %v2530_v63 = vpack.c.bf16 %v772_v57, %v770_v56  ;;  %p3316_p10 = pnand %p3315_p6, %p3973_p5  ;;  %s3320_s1 = scalar_lea.vmem %s3319_s16, 1024 }
  0xe8   : > { %2449 = vmatprep.subr.bf16.mxu0 %v2448_v19  ;;  %v470_v32 = vrot.slane %v455_v31, 1  ;;  %v456_v34 = vld [vmem:[#allocation2 + $0x40] sm:$0x1]  ;;  %2523 = vmatpush1.bf16.msra.mxu1 %v2522_v39  ;;  %v453_v61 = vld [vmem:[#allocation6 + $0x30] sm:$0xff]  ;;  %v2532_v1 = vpack.c.bf16 %v777_v59, %v775_v58  ;;  %v638_v4 = vld [vmem:[#allocation6 + $0x88] sm:$0xff]  ;;  %p3321_p11 = scmp.lt.s32.totalorder %s3848_s18, %s3319_s16  ;;  %p3322_p12 = scmp.lt.s32.totalorder %s3320_s1, %s3314_s26 }
  0xe9   : > { %v3776_v35 = vld [vmem:[#allocation2 + $0x20] sm:$0xff]  ;;  %v473_v36 = vrot.slane %v456_v34, 1  ;;  %2525 = vmatprep.subr.bf16.mxu1 %v2524_v43  ;;  %v2464_v2 = vpack.c.bf16 %v454_v62, %v453_v61  ;;  %v639_v9 = vld [vmem:[#allocation6 + $0x90] sm:$0xff]  ;;  %v640_v10 = vld [vmem:[#allocation6 + $0x98] sm:$0xff]  ;;  %p3317_p1 = pneg %p3316_p10 }
  0xea   : > { %v471_v40 = vrot.slane %v3776_v35, 1  ;;  %v445_v49 = vld [vmem:[#allocation2] sm:$0xff]  ;;  %v649_v8 = vrot.slane %v3776_v35, 2  ;;  %v2472_v11 = vpack.c.bf16 %v640_v10, %v639_v9  ;;  %v642_v14 = vld [vmem:[#allocation6 + $0xa8] sm:$0xff]  ;;  %v643_v16 = vld [vmem:[#allocation6 + $0xb0] sm:$0xff]  ;;  %p3323_p13 = por %p3322_p12, %p3321_p11 }
  0xeb   : > { %2451 = vmatpush3.bf16.msra.mxu0 %v2448_v19  ;;  %v637_v3 = vld [vmem:[#allocation6 + $0x80] sm:$0xff]  ;;  %v644_v17 = vld [vmem:[#allocation6 + $0xb8] sm:$0xff]  ;;  %v794_v20 = vld [vmem:[#allocation9 + $0x108] sm:$0xff] }
  0xec   : > { %v472_v46 = vsel %vm469_vm4, %v470_v32, %v471_v40  ;;  %2453 = vmatprep.subr.bf16.mxu0 %v2452_v33  ;;  %v474_v47 = vsel %vm469_vm4, %v471_v40, %v473_v36  ;;  %2527 = vmatpush1.bf16.msra.mxu1 %v2526_v53  ;;  %v634_v5 = vld [vmem:[#allocation2] sm:$0xfc]  ;;  %v2468_v6 = vpack.c.bf16 %v638_v4, %v637_v3  ;;  %v635_v19 = vld [vmem:[#allocation2 + $0x40] sm:$0x3]  ;;  %v795_v25 = vld [vmem:[#allocation9 + $0x110] sm:$0xff]  ;;  %p3324_p8 = pnand %p3323_p13, %p3317_p1 }
  0xed   : > { %2395 = vmatprep.mubr.msk.f32.mxu0 %vm441_vm3, %v472_v46  ;;  %2529 = vmatprep.subr.bf16.mxu1 %v2528_v55  ;;  %v648_v7 = vrot.slane %v634_v5, 2  ;;  %v641_v13 = vld [vmem:[#allocation6 + $0xa0] sm:$0xff]  ;;  %v2480_v18 = vpack.c.bf16 %v644_v17, %v643_v16  ;;  %v651_v22 = vrot.slane %v635_v19, 2  ;;  %v798_v26 = vld [vmem:[#allocation9 + $0x128] sm:$0xff]  ;;  %v799_v32 = vld [vmem:[#allocation9 + $0x130] sm:$0xff] }
  0xee   : > { %2396 = vmatmul.mubr.msk.f32.vlgmr.msra.gmra.mrb[0].mxu0 %vm441_vm3, %v474_v47  ;;  %v2476_v15 = vpack.c.bf16 %v642_v14, %v641_v13  ;;  %v796_v21 = vld [vmem:[#allocation9 + $0x118] sm:$0xff]  ;;  %v793_v24 = vld [vmem:[#allocation9 + $0x100] sm:$0xff]  ;;  %v803_v38 = vld [vmem:[#allocation9 + $0x150] sm:$0xff] }
  0xef   : > { %2455 = vmatpush3.bf16.msra.mxu0 %v2452_v33  ;;  %2414 = vmatprep.mubr.msk.f32.mxu0 %vm441_vm3, %v445_v49  ;;  %v650_v12 = vsel %vm647_vm5, %v648_v7, %v649_v8  ;;  %v2484_v23 = vpack.c.bf16 %v796_v21, %v794_v20  ;;  %v800_v27 = vld [vmem:[#allocation9 + $0x138] sm:$0xff]  ;;  %v652_v28 = vsel %vm647_vm5, %v649_v8, %v651_v22  ;;  %v797_v31 = vld [vmem:[#allocation9 + $0x120] sm:$0xff]  ;;  %v802_v33 = vld [vmem:[#allocation9 + $0x148] sm:$0xff] }
  0xf0   : > { %2457 = vmatprep.subr.bf16.mxu0 %v2456_v48  ;;  %2531 = vmatpush1.bf16.msra.mxu1 %v2530_v63  ;;  %v2486_v29 = vpack.c.bf16 %v795_v25, %v793_v24  ;;  %v2488_v30 = vpack.c.bf16 %v800_v27, %v798_v26  ;;  %v804_v34 = vld [vmem:[#allocation9 + $0x158] sm:$0xff]  ;;  %v801_v37 = vld [vmem:[#allocation9 + $0x140] sm:$0xff]  ;;  %v806_v40 = vld [vmem:[#allocation9 + $0x168] sm:$0xff] }
  0xf1   : > { %2533 = vmatprep.subr.bf16.mxu1 %v2532_v1  ;;  %v2492_v36 = vpack.c.bf16 %v804_v34, %v802_v33  ;;  %v2494_v39 = vpack.c.bf16 %v803_v38, %v801_v37  ;;  %v808_v41 = vld [vmem:[#allocation9 + $0x178] sm:$0xff]  ;;  %v774_v43 = vld [vmem:[#allocation9 + $0x80] sm:$0xff]  ;;  %v776_v44 = vld [vmem:[#allocation9 + $0x90] sm:$0xff] }
  0xf2   : > { %v2496_v42 = vpack.c.bf16 %v808_v41, %v806_v40  ;;  %v805_v45 = vld [vmem:[#allocation9 + $0x160] sm:$0xff]  ;;  %v2534_v46 = vpack.c.bf16 %v776_v44, %v774_v43  ;;  %v807_v47 = vld [vmem:[#allocation9 + $0x170] sm:$0xff]  ;;  %v779_v49 = vld [vmem:[#allocation9 + $0xa8] sm:$0xff] }
  0xf3   : > { %2459 = vmatpush3.bf16.msra.mxu0 %v2456_v48  ;;  %v2498_v48 = vpack.c.bf16 %v807_v47, %v805_v45  ;;  %v781_v50 = vld [vmem:[#allocation9 + $0xb8] sm:$0xff]  ;;  %v810_v52 = vld [vmem:[#allocation9 + $0x188] sm:$0xff]  ;;  %v778_v54 = vld [vmem:[#allocation9 + $0xa0] sm:$0xff] }
  0xf4   : > { %2461 = vmatprep.subr.bf16.mxu0 %v2460_v60  ;;  %2535 = vmatpush1.bf16.msra.mxu1 %v2534_v46  ;;  %v2536_v51 = vpack.c.bf16 %v781_v50, %v779_v49  ;;  %v812_v53 = vld [vmem:[#allocation9 + $0x198] sm:$0xff]  ;;  %v780_v56 = vld [vmem:[#allocation9 + $0xb0] sm:$0xff]  ;;  %v809_v57 = vld [vmem:[#allocation9 + $0x180] sm:$0xff] }
  0xf5   : > { %v2500_v55 = vpack.c.bf16 %v812_v53, %v810_v52  ;;  %v811_v58 = vld [vmem:[#allocation9 + $0x190] sm:$0xff]  ;;  %v2538_v59 = vpack.c.bf16 %v780_v56, %v778_v54  ;;  %v783_v61 = vld [vmem:[#allocation9 + $0xc8] sm:$0xff]  ;;  %v785_v62 = vld [vmem:[#allocation9 + $0xd8] sm:$0xff] }
  0xf6   : > { %2537 = vmatprep.subr.bf16.mxu1 %v2536_v51  ;;  %v814_v63 = vld [vmem:[#allocation9 + $0x1a8] sm:$0xff]  ;;  %v2540_v1 = vpack.c.bf16 %v785_v62, %v783_v61  ;;  %v782_v3 = vld [vmem:[#allocation9 + $0xc0] sm:$0xff]  ;;  %v784_v4 = vld [vmem:[#allocation9 + $0xd0] sm:$0xff] }
  0xf7   : > { %2463 = vmatpush3.bf16.msra.mxu0 %v2460_v60  ;;  %v2502_v60 = vpack.c.bf16 %v811_v58, %v809_v57  ;;  %v813_v7 = vld [vmem:[#allocation9 + $0x1a0] sm:$0xff]  ;;  %v815_v8 = vld [vmem:[#allocation9 + $0x1b0] sm:$0xff]  ;;  %v787_v10 = vld [vmem:[#allocation9 + $0xe8] sm:$0xff] }
  0xf8   : > { %2465 = vmatprep.subr.bf16.mxu0 %v2464_v2  ;;  %2539 = vmatpush1.bf16.msra.mxu1 %v2538_v59  ;;  %v2506_v9 = vpack.c.bf16 %v815_v8, %v813_v7  ;;  %v820_v14 = vld [vmem:[#allocation9 + $0x1d8] sm:$0xff]  ;;  %v788_v16 = vld [vmem:[#allocation9 + $0xf0] sm:$0xff]  ;;  %v817_v19 = vld [vmem:[#allocation9 + $0x1c0] sm:$0xff] }
  0xf9   : > { %2541 = vmatprep.subr.bf16.mxu1 %v2540_v1  ;;  %v819_v20 = vld [vmem:[#allocation9 + $0x1d0] sm:$0xff]  ;;  %v993_v21 = vld [vmem:[#allocation9 + $0x208] sm:$0xff]  ;;  %v824_v25 = vld [vmem:[#allocation9 + $0x1f8] sm:$0xff] }
  0xfa   : > { %v2510_v22 = vpack.c.bf16 %v819_v20, %v817_v19  ;;  %v822_v24 = vld [vmem:[#allocation9 + $0x1e8] sm:$0xff]  ;;  %v2337_v34 = vld [vmem:[#allocation8] ss:$0 sm:$0xff]  ;;  %v992_v44 = vld [vmem:[#allocation9 + $0x200] sm:$0xff] }
  0xfb   : > { %2467 = vmatpush3.bf16.msra.mxu0 %v2464_v2  ;;  %v816_v2 = vld [vmem:[#allocation9 + $0x1b8] sm:$0xff]  ;;  %v2512_v27 = vpack.c.bf16 %v824_v25, %v822_v24  ;;  %v994_v45 = vld [vmem:[#allocation9 + $0x210] sm:$0xff]  ;;  %v997_v46 = vld [vmem:[#allocation9 + $0x228] sm:$0xff] }
  0xfc   : > { %2469 = vmatprep.subr.bf16.mxu0 %v2468_v6  ;;  %v2504_v5 = vpack.c.bf16 %v816_v2, %v814_v63  ;;  %v999_v47 = vld [vmem:[#allocation9 + $0x238] sm:$0xff]  ;;  %v996_v49 = vld [vmem:[#allocation9 + $0x220] sm:$0xff]  ;;  %v998_v50 = vld [vmem:[#allocation9 + $0x230] sm:$0xff] }
  0xfd   : > { %v1001_v51 = vld [vmem:[#allocation9 + $0x248] sm:$0xff]  ;;  %v2552_v52 = vpack.c.bf16 %v999_v47, %v997_v46  ;;  %v1003_v53 = vld [vmem:[#allocation9 + $0x258] sm:$0xff]  ;;  %v2554_v63 = vpack.c.bf16 %v998_v50, %v996_v49  ;;  %v1020_v47 = vld [vmem:[#allocation9 + $0x2e0] sm:$0xff] }
  0xfe   : > { %2415 = vmatmul.mubr.msk.f32.vlgmr.msra.gmra.mrb[0].mxu0 %vm441_vm3, %v3776_v35  ;;  %v2490_v35 = vpack.c.bf16 %v799_v32, %v797_v31  ;;  %v1298_v31 = vld [vmem:[#allocation12 + $0x408] sm:$0xff]  ;;  %v1297_v54 = vld [vmem:[#allocation12 + $0x400] sm:$0xff]  ;;  %v2556_v2 = vpack.c.bf16 %v1003_v53, %v1001_v51  ;;  %v1007_v8 = vld [vmem:[#allocation9 + $0x278] sm:$0xff] }
  0xff   : > { %2471 = vmatpush3.bf16.msra.mxu0 %v2468_v6  ;;  %2433 = vmatprep.mubr.msk.f32.mxu0 %vm441_vm3, %v650_v12  ;;  %v2542_v6 = vpack.c.bf16 %v784_v4, %v782_v3  ;;  %v818_v12 = vld [vmem:[#allocation9 + $0x1c8] sm:$0xff]  ;;  %v1000_v4 = vld [vmem:[#allocation9 + $0x240] sm:$0xff] }
 0x100   : > { %2473 = vmatprep.subr.bf16.mxu0 %v2472_v11  ;;  %v2508_v17 = vpack.c.bf16 %v820_v14, %v818_v12  ;;  %v1302_v32 = vld [vmem:[#allocation12 + $0x428] sm:$0xff]  ;;  %v1317_v24 = vld [vmem:[#allocation12 + $0x4a0] sm:$0xff]  ;;  %v1300_v49 = vld [vmem:[#allocation12 + $0x418] sm:$0xff] }
 0x101   : > { %2543 = vmatpush1.bf16.msra.mxu1 %v2542_v6  ;;  %v2580_v33 = vpack.c.bf16 %v1302_v32, %v1298_v31  ;;  %v1306_v61 = vld [vmem:[#allocation12 + $0x448] sm:$0xff]  ;;  %v1015_v31 = vld [vmem:[#allocation9 + $0x2b8] sm:$0xff] }
 0x102   : > { %v1310_v62 = vld [vmem:[#allocation12 + $0x468] sm:$0xff]  ;;  %v1304_v50 = vld [vmem:[#allocation12 + $0x438] sm:$0xff] }
 0x103   : > { %2475 = vmatpush3.bf16.msra.mxu0 %v2472_v11  ;;  %v789_v11 = vld [vmem:[#allocation9 + $0xf8] sm:$0xff]  ;;  %v1005_v6 = vld [vmem:[#allocation9 + $0x268] sm:$0xff]  ;;  %v2644_v53 = vpack.c.bf16 %v1304_v50, %v1300_v49 }
 0x104   : > { %2477 = vmatprep.subr.bf16.mxu0 %v2476_v15  ;;  %v2544_v13 = vpack.c.bf16 %v789_v11, %v787_v10  ;;  %v1305_v10 = vld [vmem:[#allocation12 + $0x440] sm:$0xff]  ;;  %v1314_v12 = vld [vmem:[#allocation12 + $0x488] sm:$0xff]  ;;  %v1348_v49 = vld [vmem:[#allocation12 + $0x598] sm:$0xff] }
 0x105   : > { %v1309_v11 = vld [vmem:[#allocation12 + $0x460] sm:$0xff]  ;;  %v1352_v50 = vld [vmem:[#allocation12 + $0x5b8] sm:$0xff] }
 0x106   : > { %2545 = vmatprep.subr.bf16.mxu1 %v2544_v13  ;;  %v1318_v13 = vld [vmem:[#allocation12 + $0x4a8] sm:$0xff]  ;;  %v2586_v20 = vpack.c.bf16 %v1309_v11, %v1305_v10 }
 0x107   : > { %2479 = vmatpush3.bf16.msra.mxu0 %v2476_v15  ;;  %v786_v15 = vld [vmem:[#allocation9 + $0xe0] sm:$0xff]  ;;  %v1009_v19 = vld [vmem:[#allocation9 + $0x288] sm:$0xff] }
 0x108   : > { %2481 = vmatprep.subr.bf16.mxu0 %v2480_v18  ;;  %v1322_v11 = vld [vmem:[#allocation12 + $0x4c8] sm:$0xff] }
 0x10b   : > { %2483 = vmatpush3.bf16.msra.mxu0 %v2480_v18  ;;  %v2546_v18 = vpack.c.bf16 %v788_v16, %v786_v15  ;;  %v2560_v16 = vpack.c.bf16 %v1007_v8, %v1005_v6  ;;  %v1315_v8 = vld [vmem:[#allocation12 + $0x490] sm:$0xff] }
 0x10c   : > { %2485 = vmatprep.subr.bf16.mxu0 %v2484_v23  ;;  %v995_v23 = vld [vmem:[#allocation9 + $0x218] sm:$0xff] }
 0x10d   : > { %v2548_v26 = vpack.c.bf16 %v995_v23, %v993_v21  ;;  %2547 = vmatpush1.bf16.msra.mxu1 %v2546_v18  ;;  %v1006_v18 = vld [vmem:[#allocation9 + $0x270] sm:$0xff]  ;;  %v1011_v21 = vld [vmem:[#allocation9 + $0x298] sm:$0xff]  ;;  %v1313_v23 = vld [vmem:[#allocation12 + $0x480] sm:$0xff] }
 0x10e   : > { %2434 = vmatmul.mubr.msk.f32.vlgmr.msra.gmra.mrb[0].mxu0 %vm441_vm3, %v652_v28  ;;  %v821_v28 = vld [vmem:[#allocation9 + $0x1e0] sm:$0xff] }
 0x10f   : > { %2487 = vmatpush1.bf16.msra.mxu0 %v2486_v29  ;;  %899 = vmatprep.mubr.f32.mxu0 %v3439_v0  ;;  %v823_v29 = vld [vmem:[#allocation9 + $0x1f0] sm:$0xff] }
 0x110   : > { %2489 = vmatprep.subr.bf16.mxu0 %v2488_v30  ;;  %2549 = vmatprep.subr.bf16.mxu1 %v2548_v26  ;;  %v2514_v30 = vpack.c.bf16 %v823_v29, %v821_v28  ;;  %v2564_v26 = vpack.c.bf16 %v1011_v21, %v1009_v19  ;;  %v1010_v28 = vld [vmem:[#allocation9 + $0x290] sm:$0xff]  ;;  %v2590_v29 = vpack.c.bf16 %v1317_v24, %v1313_v23  ;;  %v1332_v24 = vld [vmem:[#allocation12 + $0x518] sm:$0xff] }
 0x111   : > { %v1323_v19 = vld [vmem:[#allocation12 + $0x4d0] sm:$0xff]  ;;  %v1334_v23 = vld [vmem:[#allocation12 + $0x528] sm:$0xff] }
 0x113   : > { %2491 = vmatpush1.bf16.msra.mxu0 %v2490_v35 }
 0x114   : > { %2493 = vmatprep.subr.bf16.mxu0 %v2492_v36 }
 0x117   : > { %2495 = vmatpush1.bf16.msra.mxu0 %v2494_v39 }
 0x118   : > { %2497 = vmatprep.subr.bf16.mxu0 %v2496_v42 }
 0x11b   : > { %2499 = vmatpush1.bf16.msra.mxu0 %v2498_v48  ;;  %v2550_v48 = vpack.c.bf16 %v994_v45, %v992_v44  ;;  %v1023_v44 = vld [vmem:[#allocation9 + $0x2f8] sm:$0xff] }
 0x11c   : > { %2501 = vmatprep.subr.bf16.mxu0 %v2500_v55  ;;  %v1301_v55 = vld [vmem:[#allocation12 + $0x420] sm:$0xff] }
 0x11d   : > { %v2582_v7 = vpack.c.bf16 %v1301_v55, %v1297_v54  ;;  %v1299_v54 = vld [vmem:[#allocation12 + $0x410] sm:$0xff] }
 0x11e   : > { %v1303_v55 = vld [vmem:[#allocation12 + $0x430] sm:$0xff] }
 0x11f   : > { %2503 = vmatpush1.bf16.msra.mxu0 %v2502_v60 }
 0x120   : > { %2505 = vmatprep.subr.bf16.mxu0 %v2504_v5  ;;  %v1002_v5 = vld [vmem:[#allocation9 + $0x250] sm:$0xff] }
 0x121   : > { %v2558_v14 = vpack.c.bf16 %v1002_v5, %v1000_v4  ;;  %v1316_v4 = vld [vmem:[#allocation12 + $0x498] sm:$0xff] }
 0x122   : > { %v1320_v5 = vld [vmem:[#allocation12 + $0x4b8] sm:$0xff] }
 0x123   : > { %2507 = vmatpush1.bf16.msra.mxu0 %v2506_v9  ;;  %v2584_v9 = vpack.c.bf16 %v1310_v62, %v1306_v61  ;;  %v2646_v61 = vpack.c.bf16 %v1303_v55, %v1299_v54  ;;  %v1349_v54 = vld [vmem:[#allocation12 + $0x5a0] sm:$0xff]  ;;  %v1347_v55 = vld [vmem:[#allocation12 + $0x590] sm:$0xff] }
 0x124   : > { %2509 = vmatprep.subr.bf16.mxu0 %v2508_v17  ;;  %v1004_v17 = vld [vmem:[#allocation9 + $0x260] sm:$0xff] }
 0x125   : > { %v2562_v25 = vpack.c.bf16 %v1006_v18, %v1004_v17 }
 0x127   : > { %2511 = vmatpush1.bf16.msra.mxu0 %v2510_v22  ;;  %v2588_v22 = vpack.c.bf16 %v1318_v13, %v1314_v12  ;;  %v1326_v12 = vld [vmem:[#allocation12 + $0x4e8] sm:$0xff]  ;;  %v1324_v13 = vld [vmem:[#allocation12 + $0x4d8] sm:$0xff] }
 0x128   : > { %2513 = vmatprep.subr.bf16.mxu0 %v2512_v27  ;;  %v1008_v27 = vld [vmem:[#allocation9 + $0x280] sm:$0xff] }
 0x129   : > { %v2566_v32 = vpack.c.bf16 %v1010_v28, %v1008_v27  ;;  %v1329_v27 = vld [vmem:[#allocation12 + $0x500] sm:$0xff] }
 0x12a   : > { %v1333_v28 = vld [vmem:[#allocation12 + $0x520] sm:$0xff] }
 0x12b   : > { %2515 = vmatpush1.bf16.msra.mxu0 %v2514_v30  ;;  %v1013_v30 = vld [vmem:[#allocation9 + $0x2a8] sm:$0xff] }
 0x12c   : > { %2581 = vmatprep.subr.bf16.mxu0 %v2580_v33  ;;  %v2568_v33 = vpack.c.bf16 %v1015_v31, %v1013_v30  ;;  %v2598_v30 = vpack.c.bf16 %v1333_v28, %v1329_v27  ;;  %v1331_v31 = vld [vmem:[#allocation12 + $0x510] sm:$0xff] }
 0x12d   : > { %v1375_v27 = vld [vmem:[#allocation12 + $0x670] sm:$0xff] }
 0x1e1   : > { %v2435_v35 = vpop.f32.mrb[0].mxu0 }
 0x1e2   : > { %v742_v36 = vadd.f32 %v2435_v35, %v2337_v34  ;;  %v723_v37 = vpop.f32.mrb[1].mxu0  ;;  %v1014_v35 = vld [vmem:[#allocation9 + $0x2b0] sm:$0xff] }
 0x1e3   : > { %v741_v38 = vadd.f32 %v2337_v34, %v723_v37  ;;  %v1012_v34 = vld [vmem:[#allocation9 + $0x2a0] sm:$0xff]  ;;  %v1019_v37 = vld [vmem:[#allocation9 + $0x2d8] sm:$0xff] }
 0x1e4   : > { %v744_v39 = vmax.f32 %v742_v36, 0.0  ;;  %v1017_v36 = vld [vmem:[#allocation9 + $0x2c8] sm:$0xff] }
 0x1e5   : > { %v743_v40 = vmax.f32 %v741_v38, 0.0  ;;  %v2570_v38 = vpack.c.bf16 %v1014_v35, %v1012_v34  ;;  %v1338_v34 = vld [vmem:[#allocation12 + $0x548] sm:$0xff] }
 0x1e6   : > { %v748_v41 = vrot.slane %v744_v39, 7  ;;  %v2572_v39 = vpack.c.bf16 %v1019_v37, %v1017_v36  ;;  %v1342_v35 = vld [vmem:[#allocation12 + $0x568] sm:$0xff]  ;;  %v1340_v36 = vld [vmem:[#allocation12 + $0x558] sm:$0xff] }
 0x1e7   : > { %v747_v42 = vrot.slane %v743_v40, 7  ;;  %v1016_v40 = vld [vmem:[#allocation9 + $0x2c0] sm:$0xff]  ;;  %v2600_v37 = vpack.c.bf16 %v1342_v35, %v1338_v34 }
 0x1e8   : > { %755 = vst [vmem:[#allocation2 + $0x40] sm:$0x1] %v748_v41  ;;  %v1384_v34 = vld [vmem:[#allocation12 + $0x6b8] sm:$0xff]  ;;  %v1377_v35 = vld [vmem:[#allocation12 + $0x680] sm:$0xff] }
 0x1e9   : > { %v3793_v43 = vsel %vm432_vm1, %v747_v42, %v748_v41  ;;  %753 = vst [vmem:[#allocation2] sm:$0xfe] %v747_v42  ;;  %v1018_v41 = vld [vmem:[#allocation9 + $0x2d0] sm:$0xff]  ;;  %v1021_v42 = vld [vmem:[#allocation9 + $0x2e8] sm:$0xff] }
 0x1ea   : > { %v829_v60 = vrot.slane %v3793_v43, 1  ;;  %v2574_v45 = vpack.c.bf16 %v1018_v41, %v1016_v40  ;;  %v2576_v46 = vpack.c.bf16 %v1023_v44, %v1021_v42  ;;  %v1341_v40 = vld [vmem:[#allocation12 + $0x560] sm:$0xff]  ;;  %v1339_v44 = vld [vmem:[#allocation12 + $0x550] sm:$0xff] }
 0x1ef   : > { %v791_v58 = vld [vmem:[#allocation2 + $0x40] sm:$0x1] }
 0x1f0   : > { %v756_v56 = vld [vmem:[#allocation2] sm:$0xff]  ;;  %v831_v3 = vrot.slane %v791_v58, 1 }
 0x1f1   : > { %v790_v57 = vld [vmem:[#allocation2] sm:$0xfe]  ;;  %977 = vmatmul.mubr.f32.vlgmr.msra.gmra.mrb[0].mxu1 %v756_v56 }
 0x1f2   : > { %v828_v59 = vrot.slane %v790_v57, 1  ;;  %2551 = vmatpush1.bf16.msra.mxu1 %v2550_v48  ;;  %982 = vmatprep.mubr.f32.mxu1 %v3439_v0  ;;  %v832_v15 = vsel %vm469_vm4, %v829_v60, %v831_v3  ;;  %v1022_v48 = vld [vmem:[#allocation9 + $0x2f0] sm:$0xff]  ;;  %v989_v51 = vld [vmem:[#allocation2] sm:$0xfc] }
 0x1f3   : > { %2553 = vmatprep.subr.bf16.mxu1 %v2552_v52  ;;  %v2578_v52 = vpack.c.bf16 %v1022_v48, %v1020_v47  ;;  %v1026_v56 = vrot.slane %v989_v51, 2  ;;  %v1308_v57 = vld [vmem:[#allocation12 + $0x458] sm:$0xff]  ;;  %v1350_v48 = vld [vmem:[#allocation12 + $0x5a8] sm:$0xff] }
 0x1f4   : > { %v830_v1 = vsel %vm469_vm4, %v828_v59, %v829_v60  ;;  %v1312_v58 = vld [vmem:[#allocation12 + $0x478] sm:$0xff]  ;;  %v1027_v60 = vrot.slane %v3793_v43, 2 }
 0x1f5   : > { %900 = vmatmul.mubr.f32.vlgmr.msra.gmra.mrb[2].mxu0 %v830_v1  ;;  %983 = vmatmul.mubr.f32.gmra.mrb[2].mxu1 %v3793_v43  ;;  %v990_v59 = vld [vmem:[#allocation2 + $0x40] sm:$0x3]  ;;  %v2648_v62 = vpack.c.bf16 %v1312_v58, %v1308_v57  ;;  %v1311_v1 = vld [vmem:[#allocation12 + $0x470] sm:$0xff]  ;;  %v1354_v58 = vld [vmem:[#allocation12 + $0x5c8] sm:$0xff] }
 0x1f6   : > { %905 = vmatprep.mubr.f32.mxu0 %v3439_v0  ;;  %2555 = vmatpush1.bf16.msra.mxu1 %v2554_v63  ;;  %v1307_v63 = vld [vmem:[#allocation12 + $0x450] sm:$0xff]  ;;  %v1029_v3 = vrot.slane %v990_v59, 2  ;;  %v1358_v59 = vld [vmem:[#allocation12 + $0x5e8] sm:$0xff] }
 0x1f7   : > { %1097 = vmatprep.mubr.f32.mxu1 %v3439_v0  ;;  %2557 = vmatprep.subr.bf16.mxu1 %v2556_v2  ;;  %v1028_v2 = vsel %vm647_vm5, %v1026_v56, %v1027_v60  ;;  %v2650_v6 = vpack.c.bf16 %v1311_v1, %v1307_v63  ;;  %v1351_v57 = vld [vmem:[#allocation12 + $0x5b0] sm:$0xff]  ;;  %v1360_v63 = vld [vmem:[#allocation12 + $0x5f8] sm:$0xff]  ;;  %v1353_v1 = vld [vmem:[#allocation12 + $0x5c0] sm:$0xff] }
 0x1f8   : > { %2583 = vmatpush1.bf16.msra.mxu0 %v2582_v7  ;;  %v2652_v7 = vpack.c.bf16 %v1320_v5, %v1316_v4  ;;  %v1030_v43 = vsel %vm647_vm5, %v1027_v60, %v1029_v3  ;;  %v2670_v60 = vpack.c.bf16 %v1351_v57, %v1347_v55  ;;  %v1357_v3 = vld [vmem:[#allocation12 + $0x5e0] sm:$0xff]  ;;  %v1355_v4 = vld [vmem:[#allocation12 + $0x5d0] sm:$0xff]  ;;  %v1394_v55 = vld [vmem:[#allocation12 + $0x708] sm:$0xff] }
 0x1f9   : > { %906 = vmatmul.mubr.f32.gmra.mrb[4].mxu0 %v832_v15  ;;  %2585 = vmatprep.subr.bf16.mxu0 %v2584_v9  ;;  %v1319_v9 = vld [vmem:[#allocation12 + $0x4b0] sm:$0xff]  ;;  %v1328_v15 = vld [vmem:[#allocation12 + $0x4f8] sm:$0xff] }
 0x1fa   : > { %2559 = vmatpush1.bf16.msra.mxu1 %v2558_v14  ;;  %v2654_v10 = vpack.c.bf16 %v1319_v9, %v1315_v8  ;;  %v2592_v14 = vpack.c.bf16 %v1326_v12, %v1322_v11  ;;  %v2656_v17 = vpack.c.bf16 %v1328_v15, %v1324_v13  ;;  %v1359_v5 = vld [vmem:[#allocation12 + $0x5f0] sm:$0xff]  ;;  %v1366_v8 = vld [vmem:[#allocation12 + $0x628] sm:$0xff]  ;;  %v1364_v9 = vld [vmem:[#allocation12 + $0x618] sm:$0xff] }
 0x1fb   : > { %2561 = vmatprep.subr.bf16.mxu1 %v2560_v16  ;;  %v1321_v16 = vld [vmem:[#allocation12 + $0x4c0] sm:$0xff]  ;;  %v1368_v11 = vld [vmem:[#allocation12 + $0x638] sm:$0xff]  ;;  %v1363_v15 = vld [vmem:[#allocation12 + $0x610] sm:$0xff] }
 0x1fc   : > { %2587 = vmatpush1.bf16.msra.mxu0 %v2586_v20  ;;  %v1327_v20 = vld [vmem:[#allocation12 + $0x4f0] sm:$0xff]  ;;  %v1361_v12 = vld [vmem:[#allocation12 + $0x600] sm:$0xff]  ;;  %v1396_v57 = vld [vmem:[#allocation12 + $0x718] sm:$0xff] }
 0x1fd   : > { %2589 = vmatprep.subr.bf16.mxu0 %v2588_v22  ;;  %v2658_v21 = vpack.c.bf16 %v1327_v20, %v1323_v19  ;;  %v1330_v22 = vld [vmem:[#allocation12 + $0x508] sm:$0xff]  ;;  %v1365_v13 = vld [vmem:[#allocation12 + $0x620] sm:$0xff]  ;;  %v1376_v19 = vld [vmem:[#allocation12 + $0x678] sm:$0xff] }
 0x1fe   : > { %2563 = vmatpush1.bf16.msra.mxu1 %v2562_v25  ;;  %v2596_v25 = vpack.c.bf16 %v1334_v23, %v1330_v22  ;;  %v2614_v20 = vpack.c.bf16 %v1365_v13, %v1361_v12  ;;  %v1369_v23 = vld [vmem:[#allocation12 + $0x640] sm:$0xff]  ;;  %v1403_v12 = vld [vmem:[#allocation12 + $0x750] sm:$0xff] }
 0x1ff   : > { %2565 = vmatprep.subr.bf16.mxu1 %v2564_v26  ;;  %v1336_v26 = vld [vmem:[#allocation12 + $0x538] sm:$0xff]  ;;  %v1407_v13 = vld [vmem:[#allocation12 + $0x770] sm:$0xff] }
 0x200   : > { %2591 = vmatpush1.bf16.msra.mxu0 %v2590_v29  ;;  %v2660_v29 = vpack.c.bf16 %v1336_v26, %v1332_v24  ;;  %v1373_v24 = vld [vmem:[#allocation12 + $0x660] sm:$0xff]  ;;  %v1371_v26 = vld [vmem:[#allocation12 + $0x650] sm:$0xff] }
 0x201   : > { %2593 = vmatprep.subr.bf16.mxu0 %v2592_v14  ;;  %v2676_v14 = vpack.c.bf16 %v1368_v11, %v1364_v9  ;;  %v2618_v28 = vpack.c.bf16 %v1373_v24, %v1369_v23  ;;  %v1401_v9 = vld [vmem:[#allocation12 + $0x740] sm:$0xff]  ;;  %v1411_v23 = vld [vmem:[#allocation12 + $0x790] sm:$0xff] }
 0x202   : > { %2567 = vmatpush1.bf16.msra.mxu1 %v2566_v32  ;;  %v1335_v32 = vld [vmem:[#allocation12 + $0x530] sm:$0xff] }
 0x203   : > { %2569 = vmatprep.subr.bf16.mxu1 %v2568_v33  ;;  %v2662_v33 = vpack.c.bf16 %v1335_v32, %v1331_v31  ;;  %v1382_v31 = vld [vmem:[#allocation12 + $0x6a8] sm:$0xff]  ;;  %v1380_v32 = vld [vmem:[#allocation12 + $0x698] sm:$0xff]  ;;  %v1415_v24 = vld [vmem:[#allocation12 + $0x7b0] sm:$0xff] }
 0x206   : > { %2571 = vmatpush1.bf16.msra.mxu1 %v2570_v38  ;;  %v1344_v38 = vld [vmem:[#allocation12 + $0x578] sm:$0xff] }
 0x207   : > { %2573 = vmatprep.subr.bf16.mxu1 %v2572_v39  ;;  %v1337_v39 = vld [vmem:[#allocation12 + $0x540] sm:$0xff]  ;;  %v2664_v41 = vpack.c.bf16 %v1344_v38, %v1340_v36 }
 0x208   : > { %v2602_v42 = vpack.c.bf16 %v1341_v40, %v1337_v39  ;;  %v1381_v36 = vld [vmem:[#allocation12 + $0x6a0] sm:$0xff]  ;;  %v1379_v39 = vld [vmem:[#allocation12 + $0x690] sm:$0xff] }
 0x209   : > { %v2622_v38 = vpack.c.bf16 %v1381_v36, %v1377_v35  ;;  %v1383_v40 = vld [vmem:[#allocation12 + $0x6b0] sm:$0xff] }
 0x20a   : > { %2575 = vmatpush1.bf16.msra.mxu1 %v2574_v45  ;;  %v1343_v45 = vld [vmem:[#allocation12 + $0x570] sm:$0xff] }
 0x20b   : > { %2577 = vmatprep.subr.bf16.mxu1 %v2576_v46  ;;  %v1346_v46 = vld [vmem:[#allocation12 + $0x588] sm:$0xff]  ;;  %v2666_v47 = vpack.c.bf16 %v1343_v45, %v1339_v44  ;;  %v1388_v45 = vld [vmem:[#allocation12 + $0x6d8] sm:$0xff]  ;;  %v1419_v35 = vld [vmem:[#allocation12 + $0x7d0] sm:$0xff] }
 0x20c   : > { %v2604_v51 = vpack.c.bf16 %v1350_v48, %v1346_v46  ;;  %v1390_v44 = vld [vmem:[#allocation12 + $0x6e8] sm:$0xff]  ;;  %v1385_v48 = vld [vmem:[#allocation12 + $0x6c0] sm:$0xff]  ;;  %v1423_v36 = vld [vmem:[#allocation12 + $0x7f0] sm:$0xff] }
 0x20e   : > { %2579 = vmatpush1.bf16.msra.mxu1 %v2578_v52  ;;  %v2668_v52 = vpack.c.bf16 %v1352_v50, %v1348_v49  ;;  %v1389_v49 = vld [vmem:[#allocation12 + $0x6e0] sm:$0xff] }
 0x20f   : > { %2645 = vmatprep.subr.bf16.mxu1 %v2644_v53  ;;  %v1345_v53 = vld [vmem:[#allocation12 + $0x580] sm:$0xff] }
 0x210   : > { %v2606_v56 = vpack.c.bf16 %v1349_v54, %v1345_v53  ;;  %v1391_v53 = vld [vmem:[#allocation12 + $0x6f0] sm:$0xff] }
 0x211   : > { %1098 = vmatmul.mubr.f32.vlgmr.msra.gmra.mrb[0].mxu1 %v1028_v2 }
 0x212   : > { %1103 = vmatprep.mubr.f32.mxu1 %v3439_v0  ;;  %2647 = vmatpush1.bf16.msra.mxu1 %v2646_v61  ;;  %v1325_v0 = vld [vmem:[#allocation12 + $0x4e0] sm:$0xff]  ;;  %v2608_v61 = vpack.c.bf16 %v1358_v59, %v1354_v58  ;;  %v1400_v59 = vld [vmem:[#allocation12 + $0x738] sm:$0xff] }
 0x213   : > { %2649 = vmatprep.subr.bf16.mxu1 %v2648_v62  ;;  %v2594_v18 = vpack.c.bf16 %v1325_v0, %v1321_v16  ;;  %v1356_v62 = vld [vmem:[#allocation12 + $0x5d8] sm:$0xff]  ;;  %v1367_v16 = vld [vmem:[#allocation12 + $0x630] sm:$0xff]  ;;  %v1370_v0 = vld [vmem:[#allocation12 + $0x648] sm:$0xff] }
 0x214   : > { %v2672_v2 = vpack.c.bf16 %v1360_v63, %v1356_v62  ;;  %v2692_v62 = vpack.c.bf16 %v1400_v59, %v1396_v57 }
 0x215   : > { %1104 = vmatmul.mubr.f32.gmra.mrb[2].mxu1 %v1030_v43  ;;  %2595 = vmatpush1.bf16.msra.mxu0 %v2594_v18  ;;  %v2674_v43 = vpack.c.bf16 %v1359_v5, %v1355_v4  ;;  %v1372_v18 = vld [vmem:[#allocation12 + $0x658] sm:$0xff]  ;;  %v1402_v4 = vld [vmem:[#allocation12 + $0x748] sm:$0xff] }
 0x216   : > { %2651 = vmatpush1.bf16.msra.mxu1 %v2650_v6  ;;  %2597 = vmatprep.subr.bf16.mxu0 %v2596_v25  ;;  %v2610_v6 = vpack.c.bf16 %v1357_v3, %v1353_v1  ;;  %v2680_v25 = vpack.c.bf16 %v1376_v19, %v1372_v18  ;;  %v1395_v1 = vld [vmem:[#allocation12 + $0x710] sm:$0xff]  ;;  %v1406_v5 = vld [vmem:[#allocation12 + $0x768] sm:$0xff]  ;;  %v1416_v18 = vld [vmem:[#allocation12 + $0x7b8] sm:$0xff] }
 0x217   : > { %2653 = vmatprep.subr.bf16.mxu1 %v2652_v7  ;;  %v1362_v7 = vld [vmem:[#allocation12 + $0x608] sm:$0xff]  ;;  %v1409_v19 = vld [vmem:[#allocation12 + $0x780] sm:$0xff] }
 0x219   : > { %2599 = vmatpush1.bf16.msra.mxu0 %v2598_v30  ;;  %v1378_v30 = vld [vmem:[#allocation12 + $0x688] sm:$0xff] }
 0x21a   : > { %2655 = vmatpush1.bf16.msra.mxu1 %v2654_v10  ;;  %2601 = vmatprep.subr.bf16.mxu0 %v2600_v37  ;;  %v2612_v10 = vpack.c.bf16 %v1366_v8, %v1362_v7  ;;  %v2684_v37 = vpack.c.bf16 %v1384_v34, %v1380_v32  ;;  %v2632_v7 = vpack.c.bf16 %v1406_v5, %v1402_v4  ;;  %v1408_v8 = vld [vmem:[#allocation12 + $0x778] sm:$0xff]  ;;  %v1421_v32 = vld [vmem:[#allocation12 + $0x7e0] sm:$0xff] }
 0x21b   : > { %2657 = vmatprep.subr.bf16.mxu1 %v2656_v17  ;;  %v1374_v17 = vld [vmem:[#allocation12 + $0x668] sm:$0xff] }
 0x21c   : > { %v2616_v22 = vpack.c.bf16 %v1374_v17, %v1370_v0  ;;  %v1412_v0 = vld [vmem:[#allocation12 + $0x798] sm:$0xff] }
 0x21d   : > { %2603 = vmatpush1.bf16.msra.mxu0 %v2602_v42  ;;  %v1386_v42 = vld [vmem:[#allocation12 + $0x6c8] sm:$0xff] }
 0x21e   : > { %2659 = vmatpush1.bf16.msra.mxu1 %v2658_v21  ;;  %2605 = vmatprep.subr.bf16.mxu0 %v2604_v51  ;;  %v2678_v21 = vpack.c.bf16 %v1367_v16, %v1363_v15  ;;  %v2624_v46 = vpack.c.bf16 %v1390_v44, %v1386_v42  ;;  %v2626_v51 = vpack.c.bf16 %v1389_v49, %v1385_v48  ;;  %v1410_v15 = vld [vmem:[#allocation12 + $0x788] sm:$0xff]  ;;  %v1171_v42 = vld [vmem:[#allocation12 + $0x38] sm:$0xff]  ;;  %v1116_v49 = vlaneseq }
 0x21f   : > { %2661 = vmatprep.subr.bf16.mxu1 %v2660_v29  ;;  %v2682_v29 = vpack.c.bf16 %v1375_v27, %v1371_v26  ;;  %v1414_v16 = vld [vmem:[#allocation12 + $0x7a8] sm:$0xff] }
 0x220   : > { %v2636_v17 = vpack.c.bf16 %v1414_v16, %v1410_v15  ;;  %v1418_v26 = vld [vmem:[#allocation12 + $0x7c8] sm:$0xff]  ;;  %v1168_v15 = vld [vmem:[#allocation12 + $0x20] sm:$0xff]  ;;  %v1166_v16 = vld [vmem:[#allocation12 + $0x10] sm:$0xff] }
 0x221   : > { %2607 = vmatpush1.bf16.msra.mxu0 %v2606_v56  ;;  %v1398_v56 = vld [vmem:[#allocation12 + $0x728] sm:$0xff] }
 0x222   : > { %2663 = vmatpush1.bf16.msra.mxu1 %v2662_v33  ;;  %2609 = vmatprep.subr.bf16.mxu0 %v2608_v61  ;;  %v2620_v33 = vpack.c.bf16 %v1382_v31, %v1378_v30  ;;  %v2628_v58 = vpack.c.bf16 %v1398_v56, %v1394_v55  ;;  %v1397_v61 = vld [vmem:[#allocation12 + $0x720] sm:$0xff]  ;;  %v1422_v27 = vld [vmem:[#allocation12 + $0x7e8] sm:$0xff]  ;;  %v1424_v30 = vld [vmem:[#allocation12 + $0x7f8] sm:$0xff] }
 0x223   : > { %2665 = vmatprep.subr.bf16.mxu1 %v2664_v41  ;;  %v2686_v41 = vpack.c.bf16 %v1383_v40, %v1379_v39  ;;  %v1417_v31 = vld [vmem:[#allocation12 + $0x7c0] sm:$0xff]  ;;  %v1169_v39 = vld [vmem:[#allocation12 + $0x28] sm:$0xff]  ;;  %v1167_v40 = vld [vmem:[#allocation12 + $0x18] sm:$0xff] }
 0x224   : > { %v2642_v34 = vpack.c.bf16 %v1421_v32, %v1417_v31  ;;  %v2772_v44 = vpack.c.bf16 %v1171_v42, %v1167_v40  ;;  %v1181_v40 = vld [vmem:[#allocation12 + $0x88] sm:$0xff] }
 0x225   : > { %2611 = vmatpush1.bf16.msra.mxu0 %v2610_v6  ;;  %v1404_v6 = vld [vmem:[#allocation12 + $0x758] sm:$0xff]  ;;  %v1185_v42 = vld [vmem:[#allocation12 + $0xa8] sm:$0xff] }
 0x226   : > { %2667 = vmatpush1.bf16.msra.mxu1 %v2666_v47  ;;  %2613 = vmatprep.subr.bf16.mxu0 %v2612_v10  ;;  %v1392_v47 = vld [vmem:[#allocation12 + $0x6f8] sm:$0xff]  ;;  %v2696_v10 = vpack.c.bf16 %v1408_v8, %v1404_v6 }
 0x227   : > { %2669 = vmatprep.subr.bf16.mxu1 %v2668_v52  ;;  %v2688_v50 = vpack.c.bf16 %v1392_v47, %v1388_v45  ;;  %v1387_v52 = vld [vmem:[#allocation12 + $0x6d0] sm:$0xff] }
 0x228   : > { %v2690_v54 = vpack.c.bf16 %v1391_v53, %v1387_v52  ;;  %v1114_v52 = vld [vmem:[#allocation11] sm:$0x3] }
 0x229   : > { %2615 = vmatpush1.bf16.msra.mxu0 %v2614_v20  ;;  %v1413_v20 = vld [vmem:[#allocation12 + $0x7a0] sm:$0xff] }
 0x22a   : > { %2671 = vmatpush1.bf16.msra.mxu1 %v2670_v60  ;;  %2617 = vmatprep.subr.bf16.mxu0 %v2616_v22  ;;  %v1393_v60 = vld [vmem:[#allocation12 + $0x700] sm:$0xff]  ;;  %v2638_v22 = vpack.c.bf16 %v1413_v20, %v1409_v19  ;;  %v1177_v19 = vld [vmem:[#allocation12 + $0x68] sm:$0xff] }
 0x22b   : > { %2673 = vmatprep.subr.bf16.mxu1 %v2672_v2  ;;  %v2630_v63 = vpack.c.bf16 %v1397_v61, %v1393_v60  ;;  %v1399_v2 = vld [vmem:[#allocation12 + $0x730] sm:$0xff] }
 0x22c   : > { %v2694_v3 = vpack.c.bf16 %v1399_v2, %v1395_v1 }
 0x22d   : > { %2619 = vmatpush1.bf16.msra.mxu0 %v2618_v28  ;;  %v1420_v28 = vld [vmem:[#allocation12 + $0x7d8] sm:$0xff] }
 0x22e   : > { %2675 = vmatpush1.bf16.msra.mxu1 %v2674_v43  ;;  %2621 = vmatprep.subr.bf16.mxu0 %v2620_v33  ;;  %v1405_v43 = vld [vmem:[#allocation12 + $0x760] sm:$0xff]  ;;  %v2704_v33 = vpack.c.bf16 %v1424_v30, %v1420_v28 }
 0x22f   : > { %2677 = vmatprep.subr.bf16.mxu1 %v2676_v14  ;;  %v2634_v11 = vpack.c.bf16 %v1405_v43, %v1401_v9  ;;  %v2698_v14 = vpack.c.bf16 %v1407_v13, %v1403_v12  ;;  %v1176_v30 = vld [vmem:[#allocation12 + $0x60] sm:$0xff] }
 0x231   : > { %2623 = vmatpush1.bf16.msra.mxu0 %v2622_v38  ;;  %v1165_v38 = vld [vmem:[#allocation12 + $0x8] sm:$0xff] }
 0x232   : > { %2679 = vmatpush1.bf16.msra.mxu1 %v2678_v21  ;;  %2625 = vmatprep.subr.bf16.mxu0 %v2624_v46  ;;  %v2700_v21 = vpack.c.bf16 %v1416_v18, %v1412_v0  ;;  %v1170_v0 = vld [vmem:[#allocation12 + $0x30] sm:$0xff]  ;;  %v1173_v18 = vld [vmem:[#allocation12 + $0x48] sm:$0xff] }
 0x233   : > { %2681 = vmatprep.subr.bf16.mxu1 %v2680_v25  ;;  %v2702_v25 = vpack.c.bf16 %v1415_v24, %v1411_v23  ;;  %v1179_v23 = vld [vmem:[#allocation12 + $0x78] sm:$0xff]  ;;  %v2774_v28 = vpack.c.bf16 %v1170_v0, %v1166_v16  ;;  %v2712_v32 = vpack.c.bf16 %v1177_v19, %v1173_v18  ;;  %v1196_v16 = vld [vmem:[#allocation12 + $0x100] sm:$0xff]  ;;  %v1198_v19 = vld [vmem:[#allocation12 + $0x110] sm:$0xff] }
 0x234   : > { %v1200_v0 = vld [vmem:[#allocation12 + $0x120] sm:$0xff] }
 0x235   : > { %2627 = vmatpush1.bf16.msra.mxu0 %v2626_v51 }
 0x236   : > { %2683 = vmatpush1.bf16.msra.mxu1 %v2682_v29  ;;  %2629 = vmatprep.subr.bf16.mxu0 %v2628_v58  ;;  %v2640_v29 = vpack.c.bf16 %v1422_v27, %v1418_v26 }
 0x237   : > { %2685 = vmatprep.subr.bf16.mxu1 %v2684_v37  ;;  %v2706_v37 = vpack.c.bf16 %v1423_v36, %v1419_v35  ;;  %v1174_v35 = vld [vmem:[#allocation12 + $0x50] sm:$0xff] }
 0x238   : > { %v1178_v36 = vld [vmem:[#allocation12 + $0x70] sm:$0xff] }
 0x239   : > { %2631 = vmatpush1.bf16.msra.mxu0 %v2630_v63 }
 0x23a   : > { %2687 = vmatpush1.bf16.msra.mxu1 %v2686_v41  ;;  %2633 = vmatprep.subr.bf16.mxu0 %v2632_v7  ;;  %v2708_v41 = vpack.c.bf16 %v1169_v39, %v1165_v38 }
 0x23b   : > { %2689 = vmatprep.subr.bf16.mxu1 %v2688_v50  ;;  %v3806_v50 = vshrl.u32 %v1116_v49, 7  ;;  %v1184_v49 = vld [vmem:[#allocation12 + $0xa0] sm:$0xff] }
 0x23d   : > { %2635 = vmatpush1.bf16.msra.mxu0 %v2634_v11  ;;  %v1118_v51 = vsub.s32 0, %v3806_v50  ;;  %v1122_v53 = vsub.s32 1, %v3806_v50 }
 0x23e   : > { %2691 = vmatpush1.bf16.msra.mxu1 %v2690_v54  ;;  %2637 = vmatprep.subr.bf16.mxu0 %v2636_v17 }
 0x23f   : > { %2693 = vmatprep.subr.bf16.mxu1 %v2692_v62  ;;  %v1119_v54 = vrot.slane %v1114_v52, %v1118_v51  ;;  %v1123_v56 = vrot.slane %v1114_v52, %v1122_v53 }
 0x241   : > { %2639 = vmatpush1.bf16.msra.mxu0 %v2638_v22  ;;  %v1175_v22 = vld [vmem:[#allocation12 + $0x58] sm:$0xff] }
 0x242   : > { %2695 = vmatpush1.bf16.msra.mxu1 %v2694_v3  ;;  %2641 = vmatprep.subr.bf16.mxu0 %v2640_v29  ;;  %v1172_v29 = vld [vmem:[#allocation12 + $0x40] sm:$0xff] }
 0x243   : > { %2697 = vmatprep.subr.bf16.mxu1 %v2696_v10 }
 0x245   : > { %2643 = vmatpush1.bf16.msra.mxu0 %v2642_v34 }
 0x246   : > { %2699 = vmatpush1.bf16.msra.mxu1 %v2698_v14  ;;  %2709 = vmatprep.subr.bf16.mxu0 %v2708_v41  ;;  %v1164_v14 = vld [vmem:[#allocation12] sm:$0xff] }
 0x247   : > { %2701 = vmatprep.subr.bf16.mxu1 %v2700_v21  ;;  %v2710_v27 = vpack.c.bf16 %v1168_v15, %v1164_v14 }
 0x24a   : > { %2703 = vmatpush1.bf16.msra.mxu1 %v2702_v25 }
 0x24b   : > { %2705 = vmatprep.subr.bf16.mxu1 %v2704_v33  ;;  %v2776_v33 = vpack.c.bf16 %v1179_v23, %v1175_v22  ;;  %v1209_v22 = vld [vmem:[#allocation12 + $0x168] sm:$0xff]  ;;  %v1207_v23 = vld [vmem:[#allocation12 + $0x158] sm:$0xff] }
 0x24e   : > { %2707 = vmatpush1.bf16.msra.mxu1 %v2706_v37 }
 0x24f   : > { %2773 = vmatprep.subr.bf16.mxu1 %v2772_v44  ;;  %v1183_v44 = vld [vmem:[#allocation12 + $0x98] sm:$0xff] }
 0x2c8   : > { %v901_v45 = vpop.f32.mrb[2].mxu0 }
 0x2c9   : > { %v903_v46 = vpop.f32.mrb[3].mxu0 }
 0x2cc   : > { %v907_v47 = vpop.f32.mrb[4].mxu0 }
 0x2cd   : > { %v909_v48 = vpop.f32.mrb[5].mxu0 }
 0x2e4   : > { %v1099_v55 = vpop.f32.mrb[0].mxu1 }
 0x2e5   : > { %v2964_v57 = vadd.f32 %v1099_v55, %v901_v45  ;;  %v1101_v58 = vpop.f32.mrb[1].mxu1  ;;  %v1187_v45 = vld [vmem:[#allocation12 + $0xb8] sm:$0xff]  ;;  %v1186_v55 = vld [vmem:[#allocation12 + $0xb0] sm:$0xff] }
 0x2e6   : > { %v2965_v59 = vadd.f32 %v1101_v58, %v903_v46  ;;  %v2714_v46 = vpack.c.bf16 %v1176_v30, %v1172_v29  ;;  %v2716_v58 = vpack.c.bf16 %v1185_v42, %v1181_v40  ;;  %v1216_v40 = vld [vmem:[#allocation12 + $0x1a0] sm:$0xff] }
 0x2e7   : > { %v1126_v60 = vadd.f32 %v2964_v57, %v1119_v54 }
 0x2e8   : > { %v1127_v61 = vadd.f32 %v2965_v59, %v1123_v56  ;;  %v1105_v62 = vpop.f32.mrb[2].mxu1  ;;  %v2780_v59 = vpack.c.bf16 %v1187_v45, %v1183_v44  ;;  %v1214_v44 = vld [vmem:[#allocation12 + $0x190] sm:$0xff] }
 0x2e9   : > { %v1130_v63 = vmax.f32 %v1126_v60, 0.0  ;;  %v2966_v1 = vadd.f32 %v1105_v62, %v907_v47  ;;  %v1107_v2 = vpop.f32.mrb[3].mxu1  ;;  %v2778_v47 = vpack.c.bf16 %v1178_v36, %v1174_v35  ;;  %v1193_v60 = vld [vmem:[#allocation12 + $0xe8] sm:$0xff]  ;;  %v1195_v62 = vld [vmem:[#allocation12 + $0xf8] sm:$0xff]  ;;  %v1218_v45 = vld [vmem:[#allocation12 + $0x1b0] sm:$0xff] }
 0x2ea   : > { %v1131_v3 = vmax.f32 %v1127_v61, 0.0  ;;  %v2967_v4 = vadd.f32 %v1107_v2, %v909_v48  ;;  %v1180_v48 = vld [vmem:[#allocation12 + $0x80] sm:$0xff]  ;;  %v1191_v61 = vld [vmem:[#allocation12 + $0xd8] sm:$0xff] }
 0x2eb   : > { %1134 = vst [vmem:[%s3815_s19] sm:$0xff] %v1130_v63  ;;  %v1142_v5 = vrot.slane %v1130_v63, 7  ;;  %v1128_v6 = vadd.f32 %v2966_v1, %v1119_v54  ;;  %v1182_v54 = vld [vmem:[#allocation12 + $0x90] sm:$0xff]  ;;  %v2718_v1 = vpack.c.bf16 %v1184_v49, %v1180_v48  ;;  %v1215_v35 = vld [vmem:[#allocation12 + $0x198] sm:$0xff] }
 0x2ec   : > { %1135 = vst [vmem:[%s3815_s19 + $0x8] sm:$0xff] %v1131_v3  ;;  %v1143_v7 = vrot.slane %v1131_v3, 7  ;;  %v1129_v8 = vadd.f32 %v2967_v4, %v1123_v56  ;;  %v1189_v56 = vld [vmem:[#allocation12 + $0xc8] sm:$0xff]  ;;  %v2782_v2 = vpack.c.bf16 %v1186_v55, %v1182_v54  ;;  %v1188_v3 = vld [vmem:[#allocation12 + $0xc0] sm:$0xff]  ;;  %v1219_v36 = vld [vmem:[#allocation12 + $0x1b8] sm:$0xff]  ;;  %v2798_v54 = vpack.c.bf16 %v1218_v45, %v1214_v44 }
 0x2ed   : > { %1154 = vst [vmem:[#allocation2] sm:$0xfe] %v1142_v5  ;;  %v1132_v9 = vmax.f32 %v1128_v6, 0.0  ;;  %v1192_v4 = vld [vmem:[#allocation12 + $0xe0] sm:$0xff]  ;;  %v2784_v6 = vpack.c.bf16 %v1195_v62, %v1191_v61  ;;  %v2796_v42 = vpack.c.bf16 %v1219_v36, %v1215_v35  ;;  %v1223_v48 = vld [vmem:[#allocation12 + $0x1d8] sm:$0xff]  ;;  %v1229_v61 = vld [vmem:[#allocation12 + $0x208] sm:$0xff] }
 0x2ee   : > { %1155 = vst [vmem:[#allocation2 + $0x8] sm:$0xfe] %v1143_v7  ;;  %v1133_v43 = vmax.f32 %v1129_v8, 0.0  ;;  %v1194_v8 = vld [vmem:[#allocation12 + $0xf0] sm:$0xff]  ;;  %v2722_v14 = vpack.c.bf16 %v1192_v4, %v1188_v3  ;;  %v1227_v49 = vld [vmem:[#allocation12 + $0x1f8] sm:$0xff]  ;;  %v1220_v55 = vld [vmem:[#allocation12 + $0x1c0] sm:$0xff] }
 0x2ef   : > { %1136 = vst [vmem:[%s3815_s19 + $0x10] sm:$0xff] %v1132_v9  ;;  %v1144_v10 = vrot.slane %v1132_v9, 7  ;;  %v1197_v9 = vld [vmem:[#allocation12 + $0x108] sm:$0xff]  ;;  %v1228_v4 = vld [vmem:[#allocation12 + $0x200] sm:$0xff]  ;;  %v1255_v36 = vld [vmem:[#allocation12 + $0x2d8] sm:$0xff] }
 0x2f0   : > { %1137 = vst [vmem:[%s3815_s19 + $0x18] sm:$0xff] %v1133_v43  ;;  %v1146_v11 = vrot.slane %v1133_v43, 7  ;;  %v1201_v43 = vld [vmem:[#allocation12 + $0x128] sm:$0xff]  ;;  %v1254_v45 = vld [vmem:[#allocation12 + $0x2d0] sm:$0xff] }
 0x2f1   : > { %v3822_v12 = vsel %vm432_vm1, %v1142_v5, %v1144_v10  ;;  %1158 = vst [vmem:[#allocation2 + $0x40] sm:$0x1] %v1144_v10  ;;  %v2720_v5 = vpack.c.bf16 %v1193_v60, %v1189_v56  ;;  %v1199_v10 = vld [vmem:[#allocation12 + $0x118] sm:$0xff]  ;;  %v1224_v56 = vld [vmem:[#allocation12 + $0x1e0] sm:$0xff]  ;;  %v1226_v60 = vld [vmem:[#allocation12 + $0x1f0] sm:$0xff] }
 0x2f2   : > { %1156 = vst [vmem:[#allocation2 + $0x20] sm:$0xff] %v3822_v12  ;;  %v3826_v13 = vsel %vm432_vm1, %v1143_v7, %v1146_v11  ;;  %1159 = vst [vmem:[#allocation2 + $0x48] sm:$0x1] %v1146_v11  ;;  %v1432_v26 = vrot.slane %v3822_v12, 1  ;;  %v1190_v7 = vld [vmem:[#allocation12 + $0xd0] sm:$0xff]  ;;  %v1203_v11 = vld [vmem:[#allocation12 + $0x138] sm:$0xff] }
 0x2f3   : > { %v1435_v25 = vrot.slane %v3826_v13, 1  ;;  %v2786_v15 = vpack.c.bf16 %v1194_v8, %v1190_v7  ;;  %v2788_v18 = vpack.c.bf16 %v1203_v11, %v1199_v10  ;;  %v1233_v62 = vld [vmem:[#allocation12 + $0x228] sm:$0xff]  ;;  %v1230_v8 = vld [vmem:[#allocation12 + $0x210] sm:$0xff]  ;;  %v1239_v11 = vld [vmem:[#allocation12 + $0x258] sm:$0xff] }
 0x2f4   : > { %v1292_v17 = vld [vmem:[#allocation2] sm:$0xfe]  ;;  %v1241_v10 = vld [vmem:[#allocation12 + $0x268] sm:$0xff] }
 0x2f5   : > { %v1293_v20 = vld [vmem:[#allocation2 + $0x8] sm:$0xfe]  ;;  %v1431_v21 = vrot.slane %v1292_v17, 1  ;;  %v2724_v17 = vpack.c.bf16 %v1201_v43, %v1197_v9  ;;  %v1234_v9 = vld [vmem:[#allocation12 + $0x230] sm:$0xff] }
 0x2f6   : > { %v1434_v24 = vrot.slane %v1293_v20, 1  ;;  %v1161_v63 = vld [vmem:[#allocation2 + $0x8] sm:$0xff]  ;;  %v1202_v20 = vld [vmem:[#allocation12 + $0x130] sm:$0xff] }
 0x2f7   : > { %v1433_v37 = vsel %vm469_vm4, %v1431_v21, %v1432_v26  ;;  %v1205_v21 = vld [vmem:[#allocation12 + $0x148] sm:$0xff] }
 0x2f8   : > { %v1436_v31 = vsel %vm469_vm4, %v1434_v24, %v1435_v25  ;;  %v1294_v34 = vld [vmem:[#allocation2 + $0x40] sm:$0x1]  ;;  %v2728_v29 = vpack.c.bf16 %v1209_v22, %v1205_v21  ;;  %v1237_v43 = vld [vmem:[#allocation12 + $0x248] sm:$0xff]  ;;  %v1242_v21 = vld [vmem:[#allocation12 + $0x270] sm:$0xff] }
 0x2f9   : > { %1509 = vmatprep.mubr.f32.mxu0 %v1436_v31  ;;  %1586 = vmatprep.mubr.f32.mxu1 %v1436_v31  ;;  %v1295_v38 = vld [vmem:[#allocation2 + $0x48] sm:$0x1]  ;;  %v1437_v39 = vrot.slane %v1294_v34, 1  ;;  %v1211_v24 = vld [vmem:[#allocation12 + $0x178] sm:$0xff]  ;;  %v1206_v31 = vld [vmem:[#allocation12 + $0x150] sm:$0xff] }
 0x2fa   : > { %1510 = vmatmul.mubr.f32.vlgmr.msra.gmra.mrb[6].mxu0 %v1433_v37  ;;  %1587 = vmatmul.mubr.f32.vlgmr.msra.gmra.mrb[4].mxu1 %v1433_v37  ;;  %v1439_v41 = vrot.slane %v1295_v38, 1  ;;  %v2792_v30 = vpack.c.bf16 %v1211_v24, %v1207_v23  ;;  %v1217_v34 = vld [vmem:[#allocation12 + $0x1a8] sm:$0xff]  ;;  %v1247_v24 = vld [vmem:[#allocation12 + $0x298] sm:$0xff] }
 0x2fb   : > { %2711 = vmatpush1.bf16.msra.mxu0 %v2710_v27  ;;  %2775 = vmatpush1.bf16.msra.mxu1 %v2774_v28  ;;  %v1438_v57 = vsel %vm469_vm4, %v1432_v26, %v1437_v39  ;;  %v2790_v26 = vpack.c.bf16 %v1202_v20, %v1198_v19  ;;  %v1204_v27 = vld [vmem:[#allocation12 + $0x140] sm:$0xff]  ;;  %v1238_v20 = vld [vmem:[#allocation12 + $0x250] sm:$0xff]  ;;  %v1245_v22 = vld [vmem:[#allocation12 + $0x288] sm:$0xff] }
 0x2fc   : > { %v1440_v52 = vsel %vm469_vm4, %v1435_v25, %v1439_v41  ;;  %2713 = vmatprep.subr.bf16.mxu0 %v2712_v32  ;;  %2777 = vmatprep.subr.bf16.mxu1 %v2776_v33  ;;  %v2726_v25 = vpack.c.bf16 %v1200_v0, %v1196_v16  ;;  %v1208_v28 = vld [vmem:[#allocation12 + $0x160] sm:$0xff]  ;;  %v1210_v32 = vld [vmem:[#allocation12 + $0x170] sm:$0xff]  ;;  %v1213_v33 = vld [vmem:[#allocation12 + $0x188] sm:$0xff]  ;;  %v2806_v16 = vpack.c.bf16 %v1234_v9, %v1230_v8 }
 0x2fd   : > { %1515 = vmatprep.mubr.f32.mxu0 %v1440_v52  ;;  %1592 = vmatprep.mubr.f32.mxu1 %v1440_v52  ;;  %v2730_v37 = vpack.c.bf16 %v1208_v28, %v1204_v27  ;;  %v2794_v38 = vpack.c.bf16 %v1210_v32, %v1206_v31  ;;  %v1212_v39 = vld [vmem:[#allocation12 + $0x180] sm:$0xff]  ;;  %v2732_v41 = vpack.c.bf16 %v1217_v34, %v1213_v33  ;;  %v1249_v23 = vld [vmem:[#allocation12 + $0x2a8] sm:$0xff]  ;;  %v1246_v32 = vld [vmem:[#allocation12 + $0x290] sm:$0xff] }
 0x2fe   : > { %1516 = vmatmul.mubr.f32.gmra.mrb[8].mxu0 %v1438_v57  ;;  %1593 = vmatmul.mubr.f32.gmra.mrb[6].mxu1 %v1438_v57  ;;  %v2734_v52 = vpack.c.bf16 %v1216_v40, %v1212_v39  ;;  %v1236_v0 = vld [vmem:[#allocation12 + $0x240] sm:$0xff]  ;;  %v2810_v27 = vpack.c.bf16 %v1242_v21, %v1238_v20  ;;  %v1250_v33 = vld [vmem:[#allocation12 + $0x2b0] sm:$0xff]  ;;  %v1253_v34 = vld [vmem:[#allocation12 + $0x2c8] sm:$0xff] }
 0x2ff   : > { %2715 = vmatpush1.bf16.msra.mxu0 %v2714_v46  ;;  %2779 = vmatpush1.bf16.msra.mxu1 %v2778_v47  ;;  %v1221_v46 = vld [vmem:[#allocation12 + $0x1c8] sm:$0xff]  ;;  %v1244_v28 = vld [vmem:[#allocation12 + $0x280] sm:$0xff]  ;;  %v2814_v39 = vpack.c.bf16 %v1250_v33, %v1246_v32  ;;  %v1270_v9 = vld [vmem:[#allocation12 + $0x350] sm:$0xff] }
 0x300   : > { %1663 = vmatprep.mubr.f32.mxu0 %v1161_v63  ;;  %1740 = vmatprep.mubr.f32.mxu1 %v1161_v63  ;;  %v1225_v47 = vld [vmem:[#allocation12 + $0x1e8] sm:$0xff]  ;;  %v1231_v63 = vld [vmem:[#allocation12 + $0x218] sm:$0xff]  ;;  %v1252_v40 = vld [vmem:[#allocation12 + $0x2c0] sm:$0xff] }
 0x301   : > { %2717 = vmatprep.subr.bf16.mxu0 %v2716_v58  ;;  %2781 = vmatprep.subr.bf16.mxu1 %v2780_v59  ;;  %v2736_v57 = vpack.c.bf16 %v1225_v47, %v1221_v46  ;;  %v2800_v58 = vpack.c.bf16 %v1227_v49, %v1223_v48  ;;  %v1222_v59 = vld [vmem:[#allocation12 + $0x1d0] sm:$0xff]  ;;  %v1257_v35 = vld [vmem:[#allocation12 + $0x2e8] sm:$0xff]  ;;  %v1263_v49 = vld [vmem:[#allocation12 + $0x318] sm:$0xff] }
 0x302   : > { %v2802_v3 = vpack.c.bf16 %v1226_v60, %v1222_v59  ;;  %v1258_v46 = vld [vmem:[#allocation12 + $0x2f0] sm:$0xff]  ;;  %v1261_v47 = vld [vmem:[#allocation12 + $0x308] sm:$0xff] }
 0x303   : > { %2719 = vmatpush1.bf16.msra.mxu0 %v2718_v1  ;;  %2783 = vmatpush1.bf16.msra.mxu1 %v2782_v2  ;;  %v1235_v1 = vld [vmem:[#allocation12 + $0x238] sm:$0xff]  ;;  %v2738_v2 = vpack.c.bf16 %v1224_v56, %v1220_v55  ;;  %v1265_v48 = vld [vmem:[#allocation12 + $0x328] sm:$0xff]  ;;  %v2818_v55 = vpack.c.bf16 %v1258_v46, %v1254_v45  ;;  %v1260_v56 = vld [vmem:[#allocation12 + $0x300] sm:$0xff] }
 0x304   : > { %2721 = vmatprep.subr.bf16.mxu0 %v2720_v5  ;;  %2785 = vmatprep.subr.bf16.mxu1 %v2784_v6  ;;  %v1232_v5 = vld [vmem:[#allocation12 + $0x220] sm:$0xff]  ;;  %v2740_v6 = vpack.c.bf16 %v1233_v62, %v1229_v61  ;;  %v2804_v7 = vpack.c.bf16 %v1235_v1, %v1231_v63  ;;  %v1262_v60 = vld [vmem:[#allocation12 + $0x310] sm:$0xff]  ;;  %v1269_v62 = vld [vmem:[#allocation12 + $0x348] sm:$0xff] }
 0x305   : > { %v1266_v61 = vld [vmem:[#allocation12 + $0x330] sm:$0xff]  ;;  %v1273_v63 = vld [vmem:[#allocation12 + $0x368] sm:$0xff]  ;;  %v1271_v1 = vld [vmem:[#allocation12 + $0x358] sm:$0xff] }
 0x306   : > { %v1278_v21 = vld [vmem:[#allocation12 + $0x390] sm:$0xff]  ;;  %v1762_v45 = vld [vmem:[#allocation12 + $0x820] sm:$0xff] }
 0x307   : > { %2723 = vmatpush1.bf16.msra.mxu0 %v2722_v14  ;;  %2787 = vmatpush1.bf16.msra.mxu1 %v2786_v15  ;;  %v1243_v14 = vld [vmem:[#allocation12 + $0x278] sm:$0xff]  ;;  %v2742_v15 = vpack.c.bf16 %v1232_v5, %v1228_v4  ;;  %v2822_v4 = vpack.c.bf16 %v1266_v61, %v1262_v60  ;;  %v1268_v5 = vld [vmem:[#allocation12 + $0x340] sm:$0xff]  ;;  %v1286_v33 = vld [vmem:[#allocation12 + $0x3d0] sm:$0xff] }
 0x308   : > { %2725 = vmatprep.subr.bf16.mxu0 %v2724_v17  ;;  %2789 = vmatprep.subr.bf16.mxu1 %v2788_v18  ;;  %v1240_v17 = vld [vmem:[#allocation12 + $0x260] sm:$0xff]  ;;  %v2744_v18 = vpack.c.bf16 %v1241_v10, %v1237_v43  ;;  %v2808_v19 = vpack.c.bf16 %v1243_v14, %v1239_v11  ;;  %v1274_v43 = vld [vmem:[#allocation12 + $0x370] sm:$0xff]  ;;  %v1277_v10 = vld [vmem:[#allocation12 + $0x388] sm:$0xff] }
 0x309   : > { %v1281_v11 = vld [vmem:[#allocation12 + $0x3a8] sm:$0xff]  ;;  %v1279_v14 = vld [vmem:[#allocation12 + $0x398] sm:$0xff]  ;;  %v1760_v46 = vld [vmem:[#allocation12 + $0x810] sm:$0xff] }
 0x30a   : > { %v1768_v60 = vld [vmem:[#allocation12 + $0x850] sm:$0xff]  ;;  %v1160_v61 = vld [vmem:[#allocation2] sm:$0xff] }
 0x30b   : > { %2727 = vmatpush1.bf16.msra.mxu0 %v2726_v25  ;;  %2791 = vmatpush1.bf16.msra.mxu1 %v2790_v26  ;;  %v1251_v25 = vld [vmem:[#allocation12 + $0x2b8] sm:$0xff]  ;;  %v2746_v26 = vpack.c.bf16 %v1240_v17, %v1236_v0  ;;  %v2826_v0 = vpack.c.bf16 %v1274_v43, %v1270_v9  ;;  %v1276_v17 = vld [vmem:[#allocation12 + $0x380] sm:$0xff] }
 0x30c   : > { %2729 = vmatprep.subr.bf16.mxu0 %v2728_v29  ;;  %2793 = vmatprep.subr.bf16.mxu1 %v2792_v30  ;;  %v1248_v29 = vld [vmem:[#allocation12 + $0x2a0] sm:$0xff]  ;;  %v2748_v30 = vpack.c.bf16 %v1249_v23, %v1245_v22  ;;  %v2812_v31 = vpack.c.bf16 %v1251_v25, %v1247_v24  ;;  %v1282_v22 = vld [vmem:[#allocation12 + $0x3b0] sm:$0xff]  ;;  %v1285_v23 = vld [vmem:[#allocation12 + $0x3c8] sm:$0xff] }
 0x30d   : > { %v1289_v24 = vld [vmem:[#allocation12 + $0x3e8] sm:$0xff]  ;;  %v1287_v25 = vld [vmem:[#allocation12 + $0x3d8] sm:$0xff]  ;;  %v1774_v43 = vld [vmem:[#allocation12 + $0x880] sm:$0xff] }
 0x30f   : > { %2731 = vmatpush1.bf16.msra.mxu0 %v2730_v37  ;;  %2795 = vmatpush1.bf16.msra.mxu1 %v2794_v38  ;;  %v1259_v37 = vld [vmem:[#allocation12 + $0x2f8] sm:$0xff]  ;;  %v2750_v38 = vpack.c.bf16 %v1248_v29, %v1244_v28  ;;  %v2830_v28 = vpack.c.bf16 %v1282_v22, %v1278_v21  ;;  %v1284_v29 = vld [vmem:[#allocation12 + $0x3c0] sm:$0xff] }
 0x310   : > { %2733 = vmatprep.subr.bf16.mxu0 %v2732_v41  ;;  %2797 = vmatprep.subr.bf16.mxu1 %v2796_v42  ;;  %v1256_v41 = vld [vmem:[#allocation12 + $0x2e0] sm:$0xff]  ;;  %v2752_v42 = vpack.c.bf16 %v1257_v35, %v1253_v34  ;;  %v2816_v44 = vpack.c.bf16 %v1259_v37, %v1255_v36  ;;  %v1290_v34 = vld [vmem:[#allocation12 + $0x3f0] sm:$0xff]  ;;  %v1759_v35 = vld [vmem:[#allocation12 + $0x808] sm:$0xff] }
 0x311   : > { %v1763_v36 = vld [vmem:[#allocation12 + $0x828] sm:$0xff]  ;;  %v1761_v37 = vld [vmem:[#allocation12 + $0x818] sm:$0xff] }
 0x313   : > { %2735 = vmatpush1.bf16.msra.mxu0 %v2734_v52  ;;  %2799 = vmatpush1.bf16.msra.mxu1 %v2798_v54  ;;  %v1267_v52 = vld [vmem:[#allocation12 + $0x338] sm:$0xff]  ;;  %v2754_v54 = vpack.c.bf16 %v1256_v41, %v1252_v40  ;;  %v2834_v40 = vpack.c.bf16 %v1290_v34, %v1286_v33  ;;  %v2836_v41 = vpack.c.bf16 %v1763_v36, %v1759_v35  ;;  %v1790_v34 = vld [vmem:[#allocation12 + $0x900] sm:$0xff] }
 0x314   : > { %2737 = vmatprep.subr.bf16.mxu0 %v2736_v57  ;;  %2801 = vmatprep.subr.bf16.mxu1 %v2800_v58  ;;  %v1264_v57 = vld [vmem:[#allocation12 + $0x320] sm:$0xff]  ;;  %v2756_v58 = vpack.c.bf16 %v1265_v48, %v1261_v47  ;;  %v2820_v59 = vpack.c.bf16 %v1267_v52, %v1263_v49  ;;  %v1764_v47 = vld [vmem:[#allocation12 + $0x830] sm:$0xff]  ;;  %v1767_v48 = vld [vmem:[#allocation12 + $0x848] sm:$0xff] }
 0x315   : > { %v1771_v49 = vld [vmem:[#allocation12 + $0x868] sm:$0xff]  ;;  %v1769_v52 = vld [vmem:[#allocation12 + $0x858] sm:$0xff]  ;;  %v1794_v35 = vld [vmem:[#allocation12 + $0x920] sm:$0xff] }
 0x317   : > { %2739 = vmatpush1.bf16.msra.mxu0 %v2738_v2  ;;  %2803 = vmatpush1.bf16.msra.mxu1 %v2802_v3  ;;  %v1275_v2 = vld [vmem:[#allocation12 + $0x378] sm:$0xff]  ;;  %v2758_v3 = vpack.c.bf16 %v1264_v57, %v1260_v56  ;;  %v2902_v57 = vpack.c.bf16 %v1764_v47, %v1760_v46  ;;  %v1798_v47 = vld [vmem:[#allocation12 + $0x940] sm:$0xff] }
 0x318   : > { %2741 = vmatprep.subr.bf16.mxu0 %v2740_v6  ;;  %2805 = vmatprep.subr.bf16.mxu1 %v2804_v7  ;;  %v1272_v6 = vld [vmem:[#allocation12 + $0x360] sm:$0xff]  ;;  %v2760_v7 = vpack.c.bf16 %v1273_v63, %v1269_v62  ;;  %v2824_v8 = vpack.c.bf16 %v1275_v2, %v1271_v1  ;;  %v2840_v62 = vpack.c.bf16 %v1771_v49, %v1767_v48  ;;  %v1772_v1 = vld [vmem:[#allocation12 + $0x870] sm:$0xff]  ;;  %v1775_v2 = vld [vmem:[#allocation12 + $0x888] sm:$0xff] }
 0x319   : > { %v2906_v9 = vpack.c.bf16 %v1772_v1, %v1768_v60  ;;  %v1802_v48 = vld [vmem:[#allocation12 + $0x960] sm:$0xff] }
 0x31a   : > { %v2858_v60 = vpack.c.bf16 %v1802_v48, %v1798_v47  ;;  %v1838_v48 = vld [vmem:[#allocation12 + $0xa80] sm:$0xff] }
 0x31b   : > { %2743 = vmatpush1.bf16.msra.mxu0 %v2742_v15  ;;  %2807 = vmatpush1.bf16.msra.mxu1 %v2806_v16  ;;  %v1283_v15 = vld [vmem:[#allocation12 + $0x3b8] sm:$0xff]  ;;  %v2762_v16 = vpack.c.bf16 %v1272_v6, %v1268_v5 }
 0x31c   : > { %2745 = vmatprep.subr.bf16.mxu0 %v2744_v18  ;;  %2809 = vmatprep.subr.bf16.mxu1 %v2808_v19  ;;  %v1280_v18 = vld [vmem:[#allocation12 + $0x3a0] sm:$0xff]  ;;  %v2764_v19 = vpack.c.bf16 %v1281_v11, %v1277_v10  ;;  %v2828_v20 = vpack.c.bf16 %v1283_v15, %v1279_v14  ;;  %v1777_v5 = vld [vmem:[#allocation12 + $0x898] sm:$0xff]  ;;  %v1776_v15 = vld [vmem:[#allocation12 + $0x890] sm:$0xff] }
 0x31d   : > { %v1781_v6 = vld [vmem:[#allocation12 + $0x8b8] sm:$0xff]  ;;  %v1778_v10 = vld [vmem:[#allocation12 + $0x8a0] sm:$0xff] }
 0x31e   : > { %v2908_v14 = vpack.c.bf16 %v1781_v6, %v1777_v5  ;;  %v2846_v21 = vpack.c.bf16 %v1778_v10, %v1774_v43  ;;  %v1815_v5 = vld [vmem:[#allocation12 + $0x9c8] sm:$0xff] }
 0x31f   : > { %2747 = vmatpush1.bf16.msra.mxu0 %v2746_v26  ;;  %2811 = vmatpush1.bf16.msra.mxu1 %v2810_v27  ;;  %v1291_v26 = vld [vmem:[#allocation12 + $0x3f8] sm:$0xff]  ;;  %v2766_v27 = vpack.c.bf16 %v1280_v18, %v1276_v17  ;;  %v1787_v18 = vld [vmem:[#allocation12 + $0x8e8] sm:$0xff] }
 0x320   : > { %2749 = vmatprep.subr.bf16.mxu0 %v2748_v30  ;;  %2813 = vmatprep.subr.bf16.mxu1 %v2812_v31  ;;  %v1288_v30 = vld [vmem:[#allocation12 + $0x3e0] sm:$0xff]  ;;  %v2768_v31 = vpack.c.bf16 %v1289_v24, %v1285_v23  ;;  %v2832_v32 = vpack.c.bf16 %v1291_v26, %v1287_v25  ;;  %v1819_v6 = vld [vmem:[#allocation12 + $0x9e8] sm:$0xff] }
 0x321   : > { %v1782_v23 = vld [vmem:[#allocation12 + $0x8c0] sm:$0xff] }
 0x322   : > { %v1786_v24 = vld [vmem:[#allocation12 + $0x8e0] sm:$0xff] }
 0x323   : > { %2751 = vmatpush1.bf16.msra.mxu0 %v2750_v38  ;;  %2815 = vmatpush1.bf16.msra.mxu1 %v2814_v39  ;;  %v1765_v38 = vld [vmem:[#allocation12 + $0x838] sm:$0xff]  ;;  %v2770_v39 = vpack.c.bf16 %v1288_v30, %v1284_v29  ;;  %v1795_v29 = vld [vmem:[#allocation12 + $0x928] sm:$0xff] }
 0x324   : > { %2753 = vmatprep.subr.bf16.mxu0 %v2752_v42  ;;  %2817 = vmatprep.subr.bf16.mxu1 %v2816_v44  ;;  %v2900_v42 = vpack.c.bf16 %v1765_v38, %v1761_v37  ;;  %v1758_v44 = vld [vmem:[#allocation12 + $0x800] sm:$0xff]  ;;  %v1793_v30 = vld [vmem:[#allocation12 + $0x918] sm:$0xff]  ;;  %v1792_v38 = vld [vmem:[#allocation12 + $0x910] sm:$0xff] }
 0x325   : > { %v2838_v56 = vpack.c.bf16 %v1762_v45, %v1758_v44  ;;  %v1805_v44 = vld [vmem:[#allocation12 + $0x978] sm:$0xff]  ;;  %v2854_v45 = vpack.c.bf16 %v1794_v35, %v1790_v34  ;;  %v1830_v35 = vld [vmem:[#allocation12 + $0xa40] sm:$0xff] }
 0x327   : > { %2755 = vmatpush1.bf16.msra.mxu0 %v2754_v54  ;;  %2819 = vmatpush1.bf16.msra.mxu1 %v2818_v55  ;;  %v1773_v54 = vld [vmem:[#allocation12 + $0x878] sm:$0xff]  ;;  %v1754_v55 = vld [vmem:[#allocation2 + $0x8] sm:$0xfc] }
 0x328   : > { %2757 = vmatprep.subr.bf16.mxu0 %v2756_v58  ;;  %2821 = vmatprep.subr.bf16.mxu1 %v2820_v59  ;;  %v1766_v58 = vld [vmem:[#allocation12 + $0x840] sm:$0xff]  ;;  %v2904_v63 = vpack.c.bf16 %v1773_v54, %v1769_v52  ;;  %v1800_v54 = vld [vmem:[#allocation12 + $0x950] sm:$0xff] }
 0x329   : > { %v1770_v59 = vld [vmem:[#allocation12 + $0x860] sm:$0xff] }
 0x32b   : > { %2759 = vmatpush1.bf16.msra.mxu0 %v2758_v3  ;;  %2823 = vmatpush1.bf16.msra.mxu1 %v2822_v4  ;;  %v1893_v3 = vrot.slane %v1754_v55, 2  ;;  %v1779_v4 = vld [vmem:[#allocation12 + $0x8a8] sm:$0xff]  ;;  %v1804_v55 = vld [vmem:[#allocation12 + $0x970] sm:$0xff] }
 0x32c   : > { %2761 = vmatprep.subr.bf16.mxu0 %v2760_v7  ;;  %2825 = vmatprep.subr.bf16.mxu1 %v2824_v8  ;;  %v2842_v7 = vpack.c.bf16 %v1770_v59, %v1766_v58  ;;  %v1894_v8 = vrot.slane %v3826_v13, 2  ;;  %v2844_v11 = vpack.c.bf16 %v1779_v4, %v1775_v2  ;;  %v1809_v58 = vld [vmem:[#allocation12 + $0x998] sm:$0xff]  ;;  %v1812_v4 = vld [vmem:[#allocation12 + $0x9b0] sm:$0xff] }
 0x32d   : > { %v1813_v59 = vld [vmem:[#allocation12 + $0x9b8] sm:$0xff] }
 0x32e   : > { %v1895_v17 = vsel %vm647_vm5, %v1893_v3, %v1894_v8  ;;  %v2924_v2 = vpack.c.bf16 %v1813_v59, %v1809_v58  ;;  %v1808_v3 = vld [vmem:[#allocation12 + $0x990] sm:$0xff]  ;;  %v1851_v58 = vld [vmem:[#allocation12 + $0xae8] sm:$0xff]  ;;  %v1849_v59 = vld [vmem:[#allocation12 + $0xad8] sm:$0xff] }
 0x32f   : > { %2763 = vmatpush1.bf16.msra.mxu0 %v2762_v16  ;;  %2827 = vmatpush1.bf16.msra.mxu1 %v2826_v0  ;;  %v1780_v16 = vld [vmem:[#allocation12 + $0x8b0] sm:$0xff]  ;;  %v1783_v0 = vld [vmem:[#allocation12 + $0x8c8] sm:$0xff]  ;;  %v2926_v10 = vpack.c.bf16 %v1812_v4, %v1808_v3 }
 0x330   : > { %2765 = vmatprep.subr.bf16.mxu0 %v2764_v19  ;;  %2829 = vmatprep.subr.bf16.mxu1 %v2828_v20  ;;  %v1785_v19 = vld [vmem:[#allocation12 + $0x8d8] sm:$0xff]  ;;  %v2910_v22 = vpack.c.bf16 %v1780_v16, %v1776_v15  ;;  %v2848_v25 = vpack.c.bf16 %v1787_v18, %v1783_v0  ;;  %v2864_v15 = vpack.c.bf16 %v1819_v6, %v1815_v5  ;;  %v1816_v0 = vld [vmem:[#allocation12 + $0x9d0] sm:$0xff]  ;;  %v1823_v18 = vld [vmem:[#allocation12 + $0xa08] sm:$0xff] }
 0x331   : > { %v1789_v20 = vld [vmem:[#allocation12 + $0x8f8] sm:$0xff]  ;;  %v1848_v4 = vld [vmem:[#allocation12 + $0xad0] sm:$0xff]  ;;  %v1855_v6 = vld [vmem:[#allocation12 + $0xb08] sm:$0xff] }
 0x332   : > { %v2912_v26 = vpack.c.bf16 %v1789_v20, %v1785_v19  ;;  %v1827_v19 = vld [vmem:[#allocation12 + $0xa28] sm:$0xff]  ;;  %v1825_v20 = vld [vmem:[#allocation12 + $0xa18] sm:$0xff]  ;;  %v1852_v5 = vld [vmem:[#allocation12 + $0xaf0] sm:$0xff] }
 0x333   : > { %2767 = vmatpush1.bf16.msra.mxu0 %v2766_v27  ;;  %2831 = vmatpush1.bf16.msra.mxu1 %v2830_v28  ;;  %v1788_v27 = vld [vmem:[#allocation12 + $0x8f0] sm:$0xff]  ;;  %v1791_v28 = vld [vmem:[#allocation12 + $0x908] sm:$0xff] }
 0x334   : > { %2769 = vmatprep.subr.bf16.mxu0 %v2768_v31  ;;  %2833 = vmatprep.subr.bf16.mxu1 %v2832_v32  ;;  %v1797_v31 = vld [vmem:[#allocation12 + $0x938] sm:$0xff]  ;;  %v2850_v32 = vpack.c.bf16 %v1786_v24, %v1782_v23  ;;  %v2852_v36 = vpack.c.bf16 %v1795_v29, %v1791_v28  ;;  %v1822_v24 = vld [vmem:[#allocation12 + $0xa00] sm:$0xff]  ;;  %v1828_v28 = vld [vmem:[#allocation12 + $0xa30] sm:$0xff] }
 0x335   : > { %v2916_v37 = vpack.c.bf16 %v1797_v31, %v1793_v30  ;;  %v1831_v29 = vld [vmem:[#allocation12 + $0xa48] sm:$0xff]  ;;  %v1833_v31 = vld [vmem:[#allocation12 + $0xa58] sm:$0xff] }
 0x336   : > { %v1835_v30 = vld [vmem:[#allocation12 + $0xa68] sm:$0xff] }
 0x337   : > { %2771 = vmatpush1.bf16.msra.mxu0 %v2770_v39  ;;  %2835 = vmatpush1.bf16.msra.mxu1 %v2834_v40  ;;  %v1796_v39 = vld [vmem:[#allocation12 + $0x930] sm:$0xff]  ;;  %v1799_v40 = vld [vmem:[#allocation12 + $0x948] sm:$0xff] }
 0x338   : > { %2837 = vmatprep.subr.bf16.mxu0 %v2836_v41  ;;  %2901 = vmatprep.subr.bf16.mxu1 %v2900_v42  ;;  %v1803_v41 = vld [vmem:[#allocation12 + $0x968] sm:$0xff]  ;;  %v1801_v42 = vld [vmem:[#allocation12 + $0x958] sm:$0xff]  ;;  %v2918_v46 = vpack.c.bf16 %v1796_v39, %v1792_v38  ;;  %v1832_v39 = vld [vmem:[#allocation12 + $0xa50] sm:$0xff] }
 0x339   : > { %v2856_v49 = vpack.c.bf16 %v1803_v41, %v1799_v40  ;;  %v2920_v52 = vpack.c.bf16 %v1805_v44, %v1801_v42  ;;  %v1836_v40 = vld [vmem:[#allocation12 + $0xa70] sm:$0xff]  ;;  %v1839_v41 = vld [vmem:[#allocation12 + $0xa88] sm:$0xff]  ;;  %v1841_v44 = vld [vmem:[#allocation12 + $0xa98] sm:$0xff] }
 0x33a   : > { %1664 = vmatmul.mubr.f32.vlgmr.msra.gmra.mrb[6].mxu0 %v1160_v61  ;;  %1741 = vmatmul.mubr.f32.vlgmr.msra.gmra.mrb[4].mxu1 %v1160_v61  ;;  %v2922_v61 = vpack.c.bf16 %v1804_v55, %v1800_v54  ;;  %v1843_v42 = vld [vmem:[#allocation12 + $0xaa8] sm:$0xff]  ;;  %v2938_v47 = vpack.c.bf16 %v1836_v40, %v1832_v39  ;;  %v1840_v55 = vld [vmem:[#allocation12 + $0xa90] sm:$0xff] }
 0x33b   : > { %1669 = vmatprep.mubr.f32.mxu0 %v3826_v13  ;;  %1746 = vmatprep.mubr.f32.mxu1 %v3826_v13  ;;  %v1872_v40 = vld [vmem:[#allocation12 + $0xb90] sm:$0xff] }
 0x33c   : > { %2839 = vmatpush1.bf16.msra.mxu0 %v2838_v56  ;;  %2903 = vmatpush1.bf16.msra.mxu1 %v2902_v57  ;;  %v1807_v56 = vld [vmem:[#allocation12 + $0x988] sm:$0xff] }
 0x33d   : > { %2841 = vmatprep.subr.bf16.mxu0 %v2840_v62  ;;  %2905 = vmatprep.subr.bf16.mxu1 %v2904_v63  ;;  %v1811_v57 = vld [vmem:[#allocation12 + $0x9a8] sm:$0xff]  ;;  %v1806_v62 = vld [vmem:[#allocation12 + $0x980] sm:$0xff] }
 0x33e   : > { %1670 = vmatmul.mubr.f32.gmra.mrb[8].mxu0 %v3822_v12  ;;  %1747 = vmatmul.mubr.f32.gmra.mrb[6].mxu1 %v3822_v12  ;;  %v1784_v12 = vld [vmem:[#allocation12 + $0x8d0] sm:$0xff]  ;;  %v1810_v63 = vld [vmem:[#allocation12 + $0x9a0] sm:$0xff]  ;;  %v2860_v1 = vpack.c.bf16 %v1811_v57, %v1807_v56  ;;  %v1847_v57 = vld [vmem:[#allocation12 + $0xac8] sm:$0xff] }
 0x33f   : > { %1968 = vmatprep.mubr.f32.mxu0 %v1895_v17  ;;  %2045 = vmatprep.mubr.f32.mxu1 %v1895_v17  ;;  %v2914_v33 = vpack.c.bf16 %v1788_v27, %v1784_v12  ;;  %v2862_v43 = vpack.c.bf16 %v1810_v63, %v1806_v62  ;;  %v1820_v17 = vld [vmem:[#allocation12 + $0x9f0] sm:$0xff]  ;;  %v1846_v63 = vld [vmem:[#allocation12 + $0xac0] sm:$0xff] }
 0x340   : > { %2843 = vmatpush1.bf16.msra.mxu0 %v2842_v7  ;;  %2907 = vmatpush1.bf16.msra.mxu1 %v2906_v9  ;;  %v1817_v7 = vld [vmem:[#allocation12 + $0x9d8] sm:$0xff]  ;;  %v2930_v23 = vpack.c.bf16 %v1820_v17, %v1816_v0  ;;  %v1824_v27 = vld [vmem:[#allocation12 + $0xa10] sm:$0xff] }
 0x341   : > { %2845 = vmatprep.subr.bf16.mxu0 %v2844_v11  ;;  %2909 = vmatprep.subr.bf16.mxu1 %v2908_v14  ;;  %v1821_v9 = vld [vmem:[#allocation12 + $0x9f8] sm:$0xff]  ;;  %v1814_v11 = vld [vmem:[#allocation12 + $0x9c0] sm:$0xff]  ;;  %v2934_v34 = vpack.c.bf16 %v1828_v28, %v1824_v27  ;;  %v1844_v56 = vld [vmem:[#allocation12 + $0xab0] sm:$0xff] }
 0x342   : > { %v1818_v14 = vld [vmem:[#allocation12 + $0x9e0] sm:$0xff]  ;;  %v2928_v16 = vpack.c.bf16 %v1821_v9, %v1817_v7  ;;  %v2942_v62 = vpack.c.bf16 %v1844_v56, %v1840_v55  ;;  %v1859_v7 = vld [vmem:[#allocation12 + $0xb28] sm:$0xff]  ;;  %v1857_v9 = vld [vmem:[#allocation12 + $0xb18] sm:$0xff] }
 0x343   : > { %v1856_v17 = vld [vmem:[#allocation12 + $0xb10] sm:$0xff]  ;;  %v1882_v55 = vld [vmem:[#allocation12 + $0xbe0] sm:$0xff] }
 0x344   : > { %2847 = vmatpush1.bf16.msra.mxu0 %v2846_v21  ;;  %2911 = vmatpush1.bf16.msra.mxu1 %v2910_v22  ;;  %v1829_v21 = vld [vmem:[#allocation12 + $0xa38] sm:$0xff]  ;;  %v2866_v22 = vpack.c.bf16 %v1818_v14, %v1814_v11  ;;  %v2946_v11 = vpack.c.bf16 %v1852_v5, %v1848_v4  ;;  %v1854_v14 = vld [vmem:[#allocation12 + $0xb00] sm:$0xff]  ;;  %v1864_v28 = vld [vmem:[#allocation12 + $0xb50] sm:$0xff] }
 0x345   : > { %2849 = vmatprep.subr.bf16.mxu0 %v2848_v25  ;;  %2913 = vmatprep.subr.bf16.mxu1 %v2912_v26  ;;  %v1826_v25 = vld [vmem:[#allocation12 + $0xa20] sm:$0xff]  ;;  %v2868_v26 = vpack.c.bf16 %v1827_v19, %v1823_v18  ;;  %v2932_v12 = vpack.c.bf16 %v1829_v21, %v1825_v20  ;;  %v1860_v18 = vld [vmem:[#allocation12 + $0xb30] sm:$0xff]  ;;  %v1863_v19 = vld [vmem:[#allocation12 + $0xb48] sm:$0xff] }
 0x346   : > { %v1867_v20 = vld [vmem:[#allocation12 + $0xb68] sm:$0xff]  ;;  %v1865_v21 = vld [vmem:[#allocation12 + $0xb58] sm:$0xff]  ;;  %v1880_v56 = vld [vmem:[#allocation12 + $0xbd0] sm:$0xff] }
 0x348   : > { %2851 = vmatpush1.bf16.msra.mxu0 %v2850_v32  ;;  %2915 = vmatpush1.bf16.msra.mxu1 %v2914_v33  ;;  %v1837_v32 = vld [vmem:[#allocation12 + $0xa78] sm:$0xff]  ;;  %v2870_v33 = vpack.c.bf16 %v1826_v25, %v1822_v24  ;;  %v2950_v24 = vpack.c.bf16 %v1860_v18, %v1856_v17  ;;  %v1862_v25 = vld [vmem:[#allocation12 + $0xb40] sm:$0xff] }
 0x349   : > { %2853 = vmatprep.subr.bf16.mxu0 %v2852_v36  ;;  %2917 = vmatprep.subr.bf16.mxu1 %v2916_v37  ;;  %v1834_v36 = vld [vmem:[#allocation12 + $0xa60] sm:$0xff]  ;;  %v2872_v37 = vpack.c.bf16 %v1835_v30, %v1831_v29  ;;  %v2936_v38 = vpack.c.bf16 %v1837_v32, %v1833_v31  ;;  %v1868_v29 = vld [vmem:[#allocation12 + $0xb70] sm:$0xff]  ;;  %v1871_v30 = vld [vmem:[#allocation12 + $0xb88] sm:$0xff] }
 0x34a   : > { %v1875_v31 = vld [vmem:[#allocation12 + $0xba8] sm:$0xff]  ;;  %v1873_v32 = vld [vmem:[#allocation12 + $0xb98] sm:$0xff] }
 0x34c   : > { %2855 = vmatpush1.bf16.msra.mxu0 %v2854_v45  ;;  %2919 = vmatpush1.bf16.msra.mxu1 %v2918_v46  ;;  %v1845_v45 = vld [vmem:[#allocation12 + $0xab8] sm:$0xff]  ;;  %v2874_v46 = vpack.c.bf16 %v1834_v36, %v1830_v35  ;;  %v2954_v35 = vpack.c.bf16 %v1868_v29, %v1864_v28  ;;  %v1870_v36 = vld [vmem:[#allocation12 + $0xb80] sm:$0xff] }
 0x34d   : > { %2857 = vmatprep.subr.bf16.mxu0 %v2856_v49  ;;  %2921 = vmatprep.subr.bf16.mxu1 %v2920_v52  ;;  %v1842_v49 = vld [vmem:[#allocation12 + $0xaa0] sm:$0xff]  ;;  %v2876_v52 = vpack.c.bf16 %v1843_v42, %v1839_v41  ;;  %v2940_v54 = vpack.c.bf16 %v1845_v45, %v1841_v44  ;;  %v1876_v41 = vld [vmem:[#allocation12 + $0xbb0] sm:$0xff]  ;;  %v1879_v42 = vld [vmem:[#allocation12 + $0xbc8] sm:$0xff] }
 0x34e   : > { %v1883_v44 = vld [vmem:[#allocation12 + $0xbe8] sm:$0xff]  ;;  %v1881_v45 = vld [vmem:[#allocation12 + $0xbd8] sm:$0xff] }
 0x350   : > { %2859 = vmatpush1.bf16.msra.mxu0 %v2858_v60  ;;  %2923 = vmatpush1.bf16.msra.mxu1 %v2922_v61  ;;  %v1853_v60 = vld [vmem:[#allocation12 + $0xaf8] sm:$0xff]  ;;  %v2878_v61 = vpack.c.bf16 %v1842_v49, %v1838_v48  ;;  %v2958_v48 = vpack.c.bf16 %v1876_v41, %v1872_v40  ;;  %v1878_v49 = vld [vmem:[#allocation12 + $0xbc0] sm:$0xff] }
 0x351   : > { %2861 = vmatprep.subr.bf16.mxu0 %v2860_v1  ;;  %2925 = vmatprep.subr.bf16.mxu1 %v2924_v2  ;;  %v1850_v1 = vld [vmem:[#allocation12 + $0xae0] sm:$0xff]  ;;  %v2880_v2 = vpack.c.bf16 %v1851_v58, %v1847_v57  ;;  %v2944_v3 = vpack.c.bf16 %v1853_v60, %v1849_v59  ;;  %v1884_v57 = vld [vmem:[#allocation12 + $0xbf0] sm:$0xff]  ;;  %v2898_v59 = vpack.c.bf16 %v1882_v55, %v1878_v49 }
 0x352   : > { %v1753_v58 = vld [vmem:[#allocation2] sm:$0xfc]  ;;  %v2962_v60 = vpack.c.bf16 %v1884_v57, %v1880_v56 }
 0x354   : > { %2863 = vmatpush1.bf16.msra.mxu0 %v2862_v43  ;;  %2927 = vmatpush1.bf16.msra.mxu1 %v2926_v10  ;;  %v1861_v43 = vld [vmem:[#allocation12 + $0xb38] sm:$0xff]  ;;  %v2882_v10 = vpack.c.bf16 %v1850_v1, %v1846_v63 }
 0x355   : > { %2865 = vmatprep.subr.bf16.mxu0 %v2864_v15  ;;  %2929 = vmatprep.subr.bf16.mxu1 %v2928_v16  ;;  %v1858_v15 = vld [vmem:[#allocation12 + $0xb20] sm:$0xff]  ;;  %v2884_v16 = vpack.c.bf16 %v1859_v7, %v1855_v6  ;;  %v2948_v0 = vpack.c.bf16 %v1861_v43, %v1857_v9  ;;  %v1755_v1 = vld [vmem:[#allocation2 + $0x40] sm:$0x3] }
 0x356   : > { %v1896_v5 = vrot.slane %v1755_v1, 2 }
 0x358   : > { %2867 = vmatpush1.bf16.msra.mxu0 %v2866_v22  ;;  %2931 = vmatpush1.bf16.msra.mxu1 %v2930_v23  ;;  %v1869_v22 = vld [vmem:[#allocation12 + $0xb78] sm:$0xff]  ;;  %v2886_v23 = vpack.c.bf16 %v1858_v15, %v1854_v14 }
 0x359   : > { %2869 = vmatprep.subr.bf16.mxu0 %v2868_v26  ;;  %2933 = vmatprep.subr.bf16.mxu1 %v2932_v12  ;;  %v1866_v26 = vld [vmem:[#allocation12 + $0xb60] sm:$0xff]  ;;  %v2888_v12 = vpack.c.bf16 %v1867_v20, %v1863_v19  ;;  %v2952_v27 = vpack.c.bf16 %v1869_v22, %v1865_v21 }
 0x35c   : > { %2871 = vmatpush1.bf16.msra.mxu0 %v2870_v33  ;;  %2935 = vmatpush1.bf16.msra.mxu1 %v2934_v34  ;;  %v1877_v33 = vld [vmem:[#allocation12 + $0xbb8] sm:$0xff]  ;;  %v2890_v34 = vpack.c.bf16 %v1866_v26, %v1862_v25 }
 0x35d   : > { %2873 = vmatprep.subr.bf16.mxu0 %v2872_v37  ;;  %2937 = vmatprep.subr.bf16.mxu1 %v2936_v38  ;;  %v1874_v37 = vld [vmem:[#allocation12 + $0xba0] sm:$0xff]  ;;  %v2892_v38 = vpack.c.bf16 %v1875_v31, %v1871_v30  ;;  %v2956_v39 = vpack.c.bf16 %v1877_v33, %v1873_v32 }
 0x360   : > { %2875 = vmatpush1.bf16.msra.mxu0 %v2874_v46  ;;  %2939 = vmatpush1.bf16.msra.mxu1 %v2938_v47  ;;  %v1885_v46 = vld [vmem:[#allocation12 + $0xbf8] sm:$0xff]  ;;  %v2894_v47 = vpack.c.bf16 %v1874_v37, %v1870_v36 }
 0x361   : > { %2877 = vmatprep.subr.bf16.mxu0 %v2876_v52  ;;  %2941 = vmatprep.subr.bf16.mxu1 %v2940_v54  ;;  %v2896_v52 = vpack.c.bf16 %v1883_v44, %v1879_v42  ;;  %v2960_v54 = vpack.c.bf16 %v1885_v46, %v1881_v45 }
 0x364   : > { %2879 = vmatpush1.bf16.msra.mxu0 %v2878_v61  ;;  %2943 = vmatpush1.bf16.msra.mxu1 %v2942_v62  ;;  %v1756_v61 = vld [vmem:[#allocation2 + $0x48] sm:$0x3]  ;;  %v1890_v62 = vrot.slane %v1753_v58, 2 }
 0x365   : > { %2881 = vmatprep.subr.bf16.mxu0 %v2880_v2  ;;  %2945 = vmatprep.subr.bf16.mxu1 %v2944_v3  ;;  %v1898_v63 = vrot.slane %v1756_v61, 2  ;;  %v3115_v2 = vld [vmem:[#allocation2 + $0x20] sm:$0xff] }
 0x366   : > { %v1891_v3 = vrot.slane %v3115_v2, 2 }
 0x367   : > { %v1899_v6 = vsel %vm647_vm5, %v1894_v8, %v1898_v63 }
 0x368   : > { %2883 = vmatpush1.bf16.msra.mxu0 %v2882_v10  ;;  %2947 = vmatpush1.bf16.msra.mxu1 %v2946_v11  ;;  %v1892_v4 = vsel %vm647_vm5, %v1890_v62, %v1891_v3  ;;  %v1897_v7 = vsel %vm647_vm5, %v1891_v3, %v1896_v5 }
 0x369   : > { %2885 = vmatprep.subr.bf16.mxu0 %v2884_v16  ;;  %2949 = vmatprep.subr.bf16.mxu1 %v2948_v0 }
 0x36c   : > { %2887 = vmatpush1.bf16.msra.mxu0 %v2886_v23  ;;  %2951 = vmatpush1.bf16.msra.mxu1 %v2950_v24 }
 0x36d   : > { %2889 = vmatprep.subr.bf16.mxu0 %v2888_v12  ;;  %2953 = vmatprep.subr.bf16.mxu1 %v2952_v27 }
 0x370   : > { %2891 = vmatpush1.bf16.msra.mxu0 %v2890_v34  ;;  %2955 = vmatpush1.bf16.msra.mxu1 %v2954_v35 }
 0x371   : > { %2893 = vmatprep.subr.bf16.mxu0 %v2892_v38  ;;  %2957 = vmatprep.subr.bf16.mxu1 %v2956_v39 }
 0x374   : > { %2895 = vmatpush1.bf16.msra.mxu0 %v2894_v47  ;;  %2959 = vmatpush1.bf16.msra.mxu1 %v2958_v48 }
 0x375   : > { %2897 = vmatprep.subr.bf16.mxu0 %v2896_v52  ;;  %2961 = vmatprep.subr.bf16.mxu1 %v2960_v54 }
 0x378   : > { %2899 = vmatpush1.bf16.msra.mxu0 %v2898_v59  ;;  %2963 = vmatpush1.bf16.msra.mxu1 %v2962_v60 }
 0x37b   : > { %1969 = vmatmul.mubr.f32.vlgmr.msra.gmra.mrb[6].mxu0 %v1892_v4  ;;  %2046 = vmatmul.mubr.f32.vlgmr.msra.gmra.mrb[4].mxu1 %v1892_v4 }
 0x37c   : > { %1974 = vmatprep.mubr.f32.mxu0 %v1899_v6  ;;  %2051 = vmatprep.mubr.f32.mxu1 %v1899_v6 }
 0x37f   : > { %1975 = vmatmul.mubr.f32.gmra.mrb[8].mxu0 %v1897_v7  ;;  %2052 = vmatmul.mubr.f32.gmra.mrb[6].mxu1 %v1897_v7 }
 0x380   : > { %3327 = shalt.err (!%p3324_p8)
}
 0x381   : > { %s3328_s3 = scalar_lea.hbm %s3854_s9, 512  ;;  %s3332_s19 = scalar_lea.hbm %s3944_s7, 1024 }
 0x382   : > { %p3329_p7 = scmp.ne.s32.totalorder %s3854_s9, %s3328_s3  ;;  %p3333_p3 = scmp.lt.u32.totalorder %s3854_s9, %s3944_s7 }
 0x383   : > { %p3334_p0 = scmp.lt.u32.totalorder %s3332_s19, %s3328_s3  ;;  %p3336_p6 = scmp.lt.u32.totalorder %s3328_s3, %s3854_s9 }
 0x384   : > { %p3330_p9 = pnand %p3329_p7, %p3973_p5 }
 0x385   : > { %p3335_p2 = por %p3334_p0, %p3333_p3 }
 0x386   : > { %p3331_p4 = pneg %p3330_p9 }
 0x387   : > { %p3337_p10 = por %p3336_p6, %p3335_p2 }
 0x389   : > { %p3338_p1 = pnand %p3337_p10, %p3331_p4 }
 0x38b   : > { %3341 = shalt.err (!%p3338_p1)
}
 0x38c   : > { %s3441_s23 = smov 256   ;;  %s3442_s26 = smov 16   ;;  %v2078_v13 = vsub.s32 2, %v3806_v50  ;;  %v2066_v8 = vld [vmem:[#allocation14] sm:$0xf]  ;;  %v2082_v9 = vsub.s32 3, %v3806_v50 }
 0x38d   : > { %3018 = dma.vmem_to_hbm [thread:$0]  (%p3973_p5), %s3848_s18, 512, %s3854_s9, %s2113_s24, %s3441_s23, %s3441_s23, %s3442_s26   ;;  %v2071_v43 = vrot.slane %v2066_v8, %v1118_v51  ;;  %v2075_v11 = vrot.slane %v2066_v8, %v1122_v53 }
 0x38e   : > { %v2079_v10 = vrot.slane %v2066_v8, %v2078_v13  ;;  %v2083_v14 = vrot.slane %v2066_v8, %v2082_v9  ;;  %s2330_s25 = sshll.u32 %s3748_s10, 6  ;;  %s2348_s24 = sshll.u32 %s3512_s11, 10 }
 0x38f   : > { %s415_s18 = scalar_lea.vmem [#allocation16], %s2330_s25  ;;  %s3893_s3 = scalar_lea.hbm %s3945_s8, %s2348_s24 }
 0x390   : > { %s2147_s9 = sshll.u32 %s415_s18, 4  ;;  %s2118_s11 = scalar_lea.sflag [#allocation17], %s3748_s10  ;;  %s3888_s9 = int_to_ptr.vmem [resolvable:$true] %s2147_s9 }
 0x391   : > { %s3342_s17 = scalar_lea.vmem %s3888_s9, 1024  ;;  %s3443_s12 = smov [#allocation16]  }
 0x392   : > { %p3343_p11 = scmp.ne.s32.totalorder %s3888_s9, %s3342_s17  ;;  %s3346_s19 = sshll.u32 %s3443_s12, 4  ;;  %s3347_s19 = int_to_ptr.vmem [resolvable:$false] %s3346_s19 }
 0x393   : > { %s3348_s20 = scalar_lea.vmem %s3347_s19, 2048  ;;  %p3349_p8 = scmp.lt.s32.totalorder %s3888_s9, %s3347_s19 }
 0x394   : > { %p3344_p12 = pnand %p3343_p11, %p3973_p5  ;;  %p3350_p7 = scmp.lt.s32.totalorder %s3348_s20, %s3342_s17 }
 0x396   : > { %p3345_p13 = pneg %p3344_p12  ;;  %p3351_p9 = por %p3350_p7, %p3349_p8 }
 0x398   : > { %p3352_p4 = pnand %p3351_p9, %p3345_p13 }
 0x44e   : > { %v1970_v15 = vpop.f32.mrb[6].mxu0  ;;  %v2047_v16 = vpop.f32.mrb[4].mxu1 }
 0x44f   : > { %v2088_v0 = vadd.f32 %v2071_v43, %v1970_v15  ;;  %v2090_v17 = vadd.f32 %v2079_v10, %v2047_v16  ;;  %v1972_v18 = vpop.f32.mrb[7].mxu0  ;;  %v2049_v19 = vpop.f32.mrb[5].mxu1 }
 0x450   : > { %v2089_v20 = vadd.f32 %v2075_v11, %v1972_v18  ;;  %v2091_v21 = vadd.f32 %v2083_v14, %v2049_v19 }
 0x451   : > { %v2096_v22 = vmax.f32 %v2088_v0, 0.0  ;;  %v2098_v23 = vmax.f32 %v2090_v17, 0.0 }
 0x452   : > { %v2097_v51 = vmax.f32 %v2089_v20, 0.0  ;;  %v2099_v24 = vmax.f32 %v2091_v21, 0.0  ;;  %v1976_v25 = vpop.f32.mrb[8].mxu0  ;;  %v2053_v50 = vpop.f32.mrb[6].mxu1 }
 0x453   : > { %2104 = vst [vmem:[%s415_s18] sm:$0xff] %v2096_v22  ;;  %2106 = vst [vmem:[%s415_s18 + $0x10] sm:$0xff] %v2098_v23  ;;  %v2092_v53 = vadd.f32 %v2071_v43, %v1976_v25  ;;  %v2094_v26 = vadd.f32 %v2079_v10, %v2053_v50  ;;  %v1978_v12 = vpop.f32.mrb[9].mxu0  ;;  %v2055_v27 = vpop.f32.mrb[7].mxu1 }
 0x454   : > { %2105 = vst [vmem:[%s415_s18 + $0x8] sm:$0xff] %v2097_v51  ;;  %2107 = vst [vmem:[%s415_s18 + $0x18] sm:$0xff] %v2099_v24  ;;  %v2093_v28 = vadd.f32 %v2075_v11, %v1978_v12  ;;  %v2095_v29 = vadd.f32 %v2083_v14, %v2055_v27 }
 0x455   : > { %v2100_v30 = vmax.f32 %v2092_v53, 0.0  ;;  %v2102_v31 = vmax.f32 %v2094_v26, 0.0 }
 0x456   : > { %v2101_v32 = vmax.f32 %v2093_v28, 0.0  ;;  %v2103_v33 = vmax.f32 %v2095_v29, 0.0 }
 0x457   : > { %2108 = vst [vmem:[%s415_s18 + $0x20] sm:$0xff] %v2100_v30  ;;  %2110 = vst [vmem:[%s415_s18 + $0x30] sm:$0xff] %v2102_v31 }
 0x458   : > { %2109 = vst [vmem:[%s415_s18 + $0x28] sm:$0xff] %v2101_v32  ;;  %2111 = vst [vmem:[%s415_s18 + $0x38] sm:$0xff] %v2103_v33 }
 0x459   : > { %3355 = shalt.err (!%p3352_p4)
}
 0x45a   : > { %s3356_s22 = scalar_lea.hbm %s3893_s3, 1024  ;;  %s3360_s25 = scalar_lea.hbm %s3945_s8, 2048 }
 0x45b   : > { %p3357_p3 = scmp.ne.s32.totalorder %s3893_s3, %s3356_s22  ;;  %p3361_p6 = scmp.lt.u32.totalorder %s3893_s3, %s3945_s8 }
 0x45c   : > { %p3362_p10 = scmp.lt.u32.totalorder %s3360_s25, %s3356_s22  ;;  %p3364_p11 = scmp.lt.u32.totalorder %s3356_s22, %s3893_s3 }
 0x45d   : > { %p3358_p0 = pnand %p3357_p3, %p3973_p5 }
 0x45e   : > { %p3363_p1 = por %p3362_p10, %p3361_p6 }
 0x45f   : > { %p3359_p2 = pneg %p3358_p0 }
 0x460   : > { %p3365_p12 = por %p3364_p11, %p3363_p1 }
 0x462   : > { %p3366_p13 = pnand %p3365_p12, %p3359_p2 }
 0x464   : > { %3369 = shalt.err (!%p3366_p13)
}
 0x465   : > { %s3444_s16 = smov 512   ;;  %s3445_s1 = smov 32  }
 0x466   : > { %3019 = dma.vmem_to_hbm [thread:$0]  (%p3973_p5), %s3888_s9, 1024, %s3893_s3, %s2118_s11, %s3444_s16, %s3444_s16, %s3445_s1  }
 0x467 PF: > { %s2162_s17 = sand.u32 1, %s3412_s27   ;;  %p3974_p8 = scmp.ne.s32.totalorder %s3962_s13, 0 }
 0x468   : > { %p3975_p7 = scmp.ge.s32.totalorder %s3424_s30, 2  ;;  %s2163_s12 = scalar_lea.sflag [#allocation5], %s2162_s17 }
 0x46a   : > { %p3046_p9 = pnand %p3975_p7, %p3974_p8 }
 0x46c   : > { %3403 = dma.done.wait (!%p3046_p9), %s2163_s12, 512  }
 0x46d   : > { %3405 = vsyncadd (!%p3046_p9), %s2163_s12, 4294966784  ;;  %s2172_s19 = scalar_lea.sflag [#allocation17], %s2162_s17 }
 0x46e   : > { %3407 = dma.done.wait (!%p3046_p9), %s2172_s19, 1024  }
 0x46f   : > { %3409 = vsyncadd (!%p3046_p9), %s2172_s19, 4294966272  ;;  %p28_p5 = scmp.ge.s32.totalorder %s3666_s15, 4   ;;  %s3976_s27 = smov %s3416_s28 }
 0x470   : > { %s3977_s28 = smov %s3420_s29  ;;  %s3978_s29 = smov %s3677_s21 }
 0x471   : > { %s3979_s30 = smov %s3666_s15  ;;  %30 = sbr.rel (!%p28_p5) target bundleno = 13 (0xd), region = 140 }
 0x478   :  { %2177 = vsyncpa [#allocation4], 1 }
 0x479   :  { %2179 = vsyncpa [#allocation4 + $0x1], 1 }
 0x47a   :  { %2180 = vsyncpa [#allocation7], 1 }
 0x47b   :  { %2181 = vsyncpa [#allocation10], 1 }
 0x47c   :  { %2182 = vsyncpa [#allocation13], 1 }
 0x47d   :  { %2183 = vsyncpa [#allocation5], 1 }
 0x47e   :  { %2185 = vsyncpa [#allocation5 + $0x1], 1 }
 0x47f   :  { %2186 = vsyncpa [#allocation17], 1 }
 0x480   :  { %2188 = vsyncpa [#allocation17 + $0x1], 1 }

</bundles_post_ra>
